<compile_context>
chip_gen: v7x
topology: tpu7x:2x2x1
jax: 0.10.0
libtpu: 0.0.40
codegen_flags: <defaults>
</compile_context>

<pallas_src>
import functools

import jax
import jax.numpy as jnp
from jax.experimental import pallas as pl
from jax.experimental.pallas import tpu as pltpu

_NEG = -1e30  # "minus infinity" that never produces inf-inf NaNs


def _label_smoothing_kernel(x_ref, t_ref, loss_ref, m_sc, l_sc, s_sc, *,
                            confidence, smooth_over_c, num_classes, class_tile,
                            needs_mask):
    """One (row-tile, class-tile) step of an online-LSE label-smoothing loss.

    loss_row = LSE(x_row) - sum_c x_row[c] * w[c],
      w[c] = confidence + smoothing/C at the target class, smoothing/C elsewhere.
    Accumulators (per row): running max m, rescaled sum of exp, sum of x*w.
    """
    k = pl.program_id(1)

    @pl.when(k == 0)
    def _init():
        m_sc[...] = jnp.full_like(m_sc, _NEG)
        l_sc[...] = jnp.zeros_like(l_sc)
        s_sc[...] = jnp.zeros_like(s_sc)

    x = x_ref[...].astype(jnp.float32)            # (tm, tc), f32 math (v5e-safe)
    t = t_ref[...]                                # (tm, 1) int32 targets

    col = jax.lax.broadcasted_iota(jnp.int32, x.shape, 1) + k * class_tile
    is_target = col == t
    if needs_mask:                                # ragged last class block
        valid = col < num_classes
        x_lse = jnp.where(valid, x, _NEG)         # masked cols contribute exp()=0
        w = jnp.where(is_target, confidence + smooth_over_c,
                      jnp.where(valid, smooth_over_c, 0.0))
        x_w = jnp.where(valid, x, 0.0)            # never multiply garbage reads
    else:
        x_lse = x
        w = jnp.where(is_target, confidence + smooth_over_c, smooth_over_c)
        x_w = x

    m_prev = m_sc[...]
    m_new = jnp.maximum(m_prev, jnp.max(x_lse, axis=-1, keepdims=True))
    alpha = jnp.exp(m_prev - m_new)
    l_sc[...] = alpha * l_sc[...] + jnp.sum(jnp.exp(x_lse - m_new),
                                            axis=-1, keepdims=True)
    s_sc[...] = s_sc[...] + jnp.sum(x_w * w, axis=-1, keepdims=True)
    m_sc[...] = m_new

    @pl.when(k == pl.num_programs(1) - 1)
    def _finalize():
        # loss = LSE - sum(x*w) = m_final + log(l_final) - s_final
        loss_ref[...] = m_sc[...] + jnp.log(l_sc[...]) - s_sc[...]


def _round_up(v, m):
    return -(-v // m) * m


def _choose_tiles(n, c, itemsize, tile_bytes):
    """Byte-budgeted (row, class) tile. Full-C blocks when they leave enough rows,
    otherwise 128-aligned class tiles with a few hundred rows (online-LSE path)."""
    sub = {4: 8, 2: 16, 1: 32}.get(itemsize, 8)   # sublane packing granularity
    n_cap = _round_up(max(n, 1), sub)
    row_bytes = max(c * itemsize, 1)
    tm_full = (tile_bytes // row_bytes) // sub * sub
    if tm_full >= 256 or tm_full >= n_cap:
        tm = max(sub, min(tm_full, n_cap, 8192))
        return tm, c
    # Large-C: tile the class axis; keep the block around the byte budget.
    tm = max(sub, min(512, n_cap))
    tc = (tile_bytes // max(tm * itemsize, 1)) // 128 * 128
    tc = max(128, min(tc, _round_up(c, 128)))
    return tm, tc


def _vmem_limit(tm, tc, itemsize):
    """Tile-derived scoped-VMEM limit, capped against physical VMEM."""
    x_block = tm * tc * itemsize
    work_f32 = tm * tc * 4                         # f32 temporaries (cast/exp/weighted)
    need = 2 * x_block + 3 * work_f32 + 32 * tm * 4 + (2 << 20)
    limit = min(max(need, 32 << 20), 100 << 20)
    try:
        phys = getattr(pltpu.get_tpu_info(), "vmem_capacity_bytes", None)
        cap = int(phys) * 3 // 4 if phys else (48 << 20)
    except Exception:
        cap = 48 << 20                             # safe on v7x (64 MiB physical)
    return int(min(limit, cap))


def label_smoothing_loss(x, target, smoothing=0.1, *,
                         x_tile_bytes=4 * 1024 * 1024,
                         block_rows=None, block_classes=None):
    """Pallas equivalent of a label-smoothing NLL loss forward.

    x:      (N, C) logits
    target: (N,)   int class indices
    returns scalar float32 loss (mean over the batch)
    """
    N, C = x.shape
    confidence = 1.0 - smoothing
    smooth_over_c = smoothing / C                  # trace-time constant

    tm, tc = _choose_tiles(N, C, x.dtype.itemsize, x_tile_bytes)
    if block_rows is not None:
        tm = int(block_rows)                       # test/tuning override (multiple of 8)
    if block_classes is not None:
        tc = int(block_classes)                    # test/tuning override (128-mult or C)

    grid_r = pl.cdiv(N, tm)
    grid_c = pl.cdiv(C, tc)
    needs_mask = grid_c * tc > C                   # only the ragged class block

    t2d = target.astype(jnp.int32).reshape(N, 1)

    kernel = functools.partial(
        _label_smoothing_kernel,
        confidence=float(confidence),
        smooth_over_c=float(smooth_over_c),
        num_classes=C,
        class_tile=tc,
        needs_mask=bool(needs_mask),
    )

    per_row = pl.pallas_call(
        kernel,
        out_shape=jax.ShapeDtypeStruct((N, 1), jnp.float32),
        grid_spec=pltpu.PrefetchScalarGridSpec(
            num_scalar_prefetch=0,
            grid=(grid_r, grid_c),                 # reduction (class) axis last
            in_specs=[
                pl.BlockSpec((tm, tc), lambda i, k: (i, k)),
                pl.BlockSpec((tm, 1), lambda i, k: (i, 0)),
            ],
            out_specs=pl.BlockSpec((tm, 1), lambda i, k: (i, 0)),  # resident across k
            scratch_shapes=[pltpu.VMEM((tm, 1), jnp.float32)] * 3,
        ),
        compiler_params=pltpu.CompilerParams(
            dimension_semantics=("parallel", "arbitrary"),
            vmem_limit_bytes=_vmem_limit(tm, tc, x.dtype.itemsize),
        ),
    )(x, t2d)

    return jnp.mean(per_row)                       # tiny wrapper-side reduction


def _reference_loss(x, target, smoothing):
    confidence = 1.0 - smoothing
    logprobs = jax.nn.log_softmax(x.astype(jnp.float32), axis=-1)
    nll = -jnp.take_along_axis(logprobs, target[:, None], axis=-1)[:, 0]
    smooth = -jnp.mean(logprobs, axis=-1)
    return jnp.mean(confidence * nll + smoothing * smooth)


if __name__ == "__main__":
    key = jax.random.PRNGKey(0)
    kx1, kt1, kx2, kt2 = jax.random.split(key, 4)
    smoothing = 0.1

    # Case 1: aligned small shapes, auto tiles -> single (N, C) block.
    N1, C1 = 256, 128
    x1 = jax.random.normal(kx1, (N1, C1), dtype=jnp.float32)
    t1 = jax.random.randint(kt1, (N1,), 0, C1, dtype=jnp.int32)
    ref1 = _reference_loss(x1, t1, smoothing)
    out1 = jax.block_until_ready(label_smoothing_loss(x1, t1, smoothing=smoothing))
    assert jnp.allclose(out1, ref1, atol=1e-4, rtol=1e-5), (out1, ref1)

    # Case 2: ragged N and C with a forced multi-tile grid -> exercises cdiv edge
    # blocks, in-kernel class masking, and the online-LSE accumulator path.
    N2, C2 = 200, 320
    x2 = jax.random.normal(kx2, (N2, C2), dtype=jnp.float32)
    t2 = jax.random.randint(kt2, (N2,), 0, C2, dtype=jnp.int32)
    ref2 = _reference_loss(x2, t2, smoothing)
    out2 = jax.block_until_ready(
        label_smoothing_loss(x2, t2, smoothing=smoothing,
                             block_rows=64, block_classes=128))
    assert jnp.allclose(out2, ref2, atol=1e-4, rtol=1e-5), (out2, ref2)

    # Case 2b: same ragged shapes through the auto tile chooser (full-C block).
    out2b = jax.block_until_ready(label_smoothing_loss(x2, t2, smoothing=smoothing))
    assert jnp.allclose(out2b, ref2, atol=1e-4, rtol=1e-5), (out2b, ref2)

    print("KERNEL_OK")
</pallas_src>

<mosaic_0001>
module attributes {stable_mosaic.version = 11 : i64} {
  func.func @_label_smoothing_kernel(%arg0: i32, %arg1: i32, %arg2: memref<256x128xf32, #tpu.memory_space<vmem>>, %arg3: memref<256x1xi32, #tpu.memory_space<vmem>>, %arg4: memref<256x1xf32, #tpu.memory_space<vmem>>, %arg5: memref<256x1xf32, #tpu.memory_space<vmem>>, %arg6: memref<256x1xf32, #tpu.memory_space<vmem>>, %arg7: memref<256x1xf32, #tpu.memory_space<vmem>>) attributes {dimension_semantics = [#tpu.dimension_semantics<parallel>, #tpu.dimension_semantics<arbitrary>], iteration_bounds = array<i64: 1, 1>, scalar_prefetch = 0 : i64, scratch_operands = 3 : i64, tpu.core_type = #tpu.core_type<tc>, window_params = [{transform_indices = @transform_0, window_bounds = array<i64: 256, 128>}, {transform_indices = @transform_1, window_bounds = array<i64: 256, 1>}, {transform_indices = @transform_2, window_bounds = array<i64: 256, 1>}]} {
    %c0_i32 = arith.constant 0 : i32
    %0 = arith.cmpi eq, %arg1, %c0_i32 : i32
    %1 = arith.extui %0 : i1 to i32
    %c0_i32_0 = arith.constant 0 : i32
    %2 = arith.cmpi ne, %1, %c0_i32_0 : i32
    scf.if %2 {
      %cst_22 = arith.constant -1.000000e+30 : f32
      %39 = vector.broadcast %cst_22 : f32 to vector<256x1xf32>
      %c0_23 = arith.constant 0 : index
      %c0_24 = arith.constant 0 : index
      %40 = vector.load %arg5[%c0_23, %c0_24] : memref<256x1xf32, #tpu.memory_space<vmem>>, vector<256x1xf32>
      tpu.vector_store %arg5[%c0_23, %c0_24], %39 {strides = array<i32>} : memref<256x1xf32, #tpu.memory_space<vmem>>, vector<256x1xf32>,
      %cst_25 = arith.constant 0.000000e+00 : f32
      %41 = vector.broadcast %cst_25 : f32 to vector<256x1xf32>
      %c0_26 = arith.constant 0 : index
      %c0_27 = arith.constant 0 : index
      %42 = vector.load %arg6[%c0_26, %c0_27] : memref<256x1xf32, #tpu.memory_space<vmem>>, vector<256x1xf32>
      tpu.vector_store %arg6[%c0_26, %c0_27], %41 {strides = array<i32>} : memref<256x1xf32, #tpu.memory_space<vmem>>, vector<256x1xf32>,
      %cst_28 = arith.constant 0.000000e+00 : f32
      %43 = vector.broadcast %cst_28 : f32 to vector<256x1xf32>
      %c0_29 = arith.constant 0 : index
      %c0_30 = arith.constant 0 : index
      %44 = vector.load %arg7[%c0_29, %c0_30] : memref<256x1xf32, #tpu.memory_space<vmem>>, vector<256x1xf32>
      tpu.vector_store %arg7[%c0_29, %c0_30], %43 {strides = array<i32>} : memref<256x1xf32, #tpu.memory_space<vmem>>, vector<256x1xf32>,
    } else {
    }
    %c0 = arith.constant 0 : index
    %c0_1 = arith.constant 0 : index
    %3 = vector.load %arg2[%c0, %c0_1] : memref<256x128xf32, #tpu.memory_space<vmem>>, vector<256x128xf32>
    %c0_2 = arith.constant 0 : index
    %c0_3 = arith.constant 0 : index
    %4 = vector.load %arg3[%c0_2, %c0_3] : memref<256x1xi32, #tpu.memory_space<vmem>>, vector<256x1xi32>
    %5 = tpu.iota {dimensions = array<i32: 1>} : vector<256x128xi32>
    %c128_i32 = arith.constant 128 : i32
    %6 = arith.muli %arg1, %c128_i32 : i32
    %7 = vector.broadcast %6 : i32 to vector<256x128xi32>
    %8 = arith.addi %5, %7 : vector<256x128xi32>
    %9 = vector.broadcast %4 : vector<256x1xi32> to vector<256x128xi32>
    %10 = arith.cmpi eq, %8, %9 : vector<256x128xi32>
    %cst = arith.constant 0.900781273 : f32
    %cst_4 = arith.constant 7.812500e-04 : f32
    %11 = vector.broadcast %cst : f32 to vector<256x128xf32>
    %12 = vector.broadcast %cst_4 : f32 to vector<256x128xf32>
    %13 = arith.select %10, %11, %12 : vector<256x128xi1>, vector<256x128xf32>
    %c0_5 = arith.constant 0 : index
    %c0_6 = arith.constant 0 : index
    %14 = vector.load %arg5[%c0_5, %c0_6] : memref<256x1xf32, #tpu.memory_space<vmem>>, vector<256x1xf32>
    %cst_7 = arith.constant dense<0xFF800000> : vector<256xf32>
    %15 = vector.multi_reduction <maximumf>, %3, %cst_7 [1] : vector<256x128xf32> to vector<256xf32>
    %16 = vector.shape_cast %15 : vector<256xf32> to vector<256x1xf32>
    %17 = arith.maximumf %14, %16 : vector<256x1xf32>
    %18 = arith.subf %14, %17 : vector<256x1xf32>
    %19 = math.exp %18 : vector<256x1xf32>
    %c0_8 = arith.constant 0 : index
    %c0_9 = arith.constant 0 : index
    %20 = vector.load %arg6[%c0_8, %c0_9] : memref<256x1xf32, #tpu.memory_space<vmem>>, vector<256x1xf32>
    %21 = arith.mulf %19, %20 : vector<256x1xf32>
    %22 = vector.broadcast %17 : vector<256x1xf32> to vector<256x128xf32>
    %23 = arith.subf %3, %22 : vector<256x128xf32>
    %24 = math.exp %23 : vector<256x128xf32>
    %cst_10 = arith.constant dense<0.000000e+00> : vector<256xf32>
    %25 = vector.multi_reduction <add>, %24, %cst_10 [1] : vector<256x128xf32> to vector<256xf32>
    %26 = vector.shape_cast %25 : vector<256xf32> to vector<256x1xf32>
    %27 = arith.addf %21, %26 : vector<256x1xf32>
    %c0_11 = arith.constant 0 : index
    %c0_12 = arith.constant 0 : index
    %28 = vector.load %arg6[%c0_11, %c0_12] : memref<256x1xf32, #tpu.memory_space<vmem>>, vector<256x1xf32>
    tpu.vector_store %arg6[%c0_11, %c0_12], %27 {strides = array<i32>} : memref<256x1xf32, #tpu.memory_space<vmem>>, vector<256x1xf32>,
    %c0_13 = arith.constant 0 : index
    %c0_14 = arith.constant 0 : index
    %29 = vector.load %arg7[%c0_13, %c0_14] : memref<256x1xf32, #tpu.memory_space<vmem>>, vector<256x1xf32>
    %30 = arith.mulf %3, %13 : vector<256x128xf32>
    %cst_15 = arith.constant dense<0.000000e+00> : vector<256xf32>
    %31 = vector.multi_reduction <add>, %30, %cst_15 [1] : vector<256x128xf32> to vector<256xf32>
    %32 = vector.shape_cast %31 : vector<256xf32> to vector<256x1xf32>
    %33 = arith.addf %29, %32 : vector<256x1xf32>
    %c0_16 = arith.constant 0 : index
    %c0_17 = arith.constant 0 : index
    %34 = vector.load %arg7[%c0_16, %c0_17] : memref<256x1xf32, #tpu.memory_space<vmem>>, vector<256x1xf32>
    tpu.vector_store %arg7[%c0_16, %c0_17], %33 {strides = array<i32>} : memref<256x1xf32, #tpu.memory_space<vmem>>, vector<256x1xf32>,
    %c0_18 = arith.constant 0 : index
    %c0_19 = arith.constant 0 : index
    %35 = vector.load %arg5[%c0_18, %c0_19] : memref<256x1xf32, #tpu.memory_space<vmem>>, vector<256x1xf32>
    tpu.vector_store %arg5[%c0_18, %c0_19], %17 {strides = array<i32>} : memref<256x1xf32, #tpu.memory_space<vmem>>, vector<256x1xf32>,
    %c0_i32_20 = arith.constant 0 : i32
    %36 = arith.cmpi eq, %arg1, %c0_i32_20 : i32
    %37 = arith.extui %36 : i1 to i32
    %c0_i32_21 = arith.constant 0 : i32
    %38 = arith.cmpi ne, %37, %c0_i32_21 : i32
    scf.if %38 {
      %c0_22 = arith.constant 0 : index
      %c0_23 = arith.constant 0 : index
      %39 = vector.load %arg5[%c0_22, %c0_23] : memref<256x1xf32, #tpu.memory_space<vmem>>, vector<256x1xf32>
      %c0_24 = arith.constant 0 : index
      %c0_25 = arith.constant 0 : index
      %40 = vector.load %arg6[%c0_24, %c0_25] : memref<256x1xf32, #tpu.memory_space<vmem>>, vector<256x1xf32>
      %41 = math.log %40 : vector<256x1xf32>
      %42 = arith.addf %39, %41 : vector<256x1xf32>
      %c0_26 = arith.constant 0 : index
      %c0_27 = arith.constant 0 : index
      %43 = vector.load %arg7[%c0_26, %c0_27] : memref<256x1xf32, #tpu.memory_space<vmem>>, vector<256x1xf32>
      %44 = arith.subf %42, %43 : vector<256x1xf32>
      %c0_28 = arith.constant 0 : index
      %c0_29 = arith.constant 0 : index
      %45 = vector.load %arg4[%c0_28, %c0_29] : memref<256x1xf32, #tpu.memory_space<vmem>>, vector<256x1xf32>
      tpu.vector_store %arg4[%c0_28, %c0_29], %44 {strides = array<i32>} : memref<256x1xf32, #tpu.memory_space<vmem>>, vector<256x1xf32>,
    } else {
    }
    return
  }
  func.func @transform_0(%arg0: i32, %arg1: i32) -> (i32, i32) {
    %c0_i32 = arith.constant 0 : i32
    return %arg0, %arg1 : i32, i32
  }
  func.func @transform_1(%arg0: i32, %arg1: i32) -> (i32, i32) {
    %c0_i32 = arith.constant 0 : i32
    %c0_i32_0 = arith.constant 0 : i32
    return %arg0, %c0_i32 : i32, i32
  }
  func.func @transform_2(%arg0: i32, %arg1: i32) -> (i32, i32) {
    %c0_i32 = arith.constant 0 : i32
    %c0_i32_0 = arith.constant 0 : i32
    return %arg0, %c0_i32 : i32, i32
  }
}

</mosaic_0001>

<bundles_post_ra>
// kernel: tpu_custom_call.1
= control target key start
LH: loop header
LB: loop body
LE: loop exit
PB: predicated region body
PF: predicated region fallthrough
CT: control target
= control target key end

     0   :  { %v1731_v2 = vmov 0   ;;  %vm15_vm0 = vcmask 7168   ;;  %v1732_v7 = vmov -1e+30   ;;  %v1733_v16 = vmov 0.0   ;;  %s3096_s0 = inlined_call_operand.vmem [shape: f32[256,128], index: 0, kind: input, shape index: {}]   ;;  %s3097_s1 = inlined_call_operand.vmem [shape: s32[256,1], index: 1, kind: input, shape index: {}]   ;;  %s3098_s2 = inlined_call_operand.vmem [shape: f32[256,1], index: 2, kind: output, shape index: {}]  }
   0x1   :  { %v1753_v0 = vld [vmem:[%s3096_s0 + $0x8] sm:$0xff]  ;;  %v1758_v1 = vld [vmem:[%s3096_s0] sm:$0xff]  ;;  %1505 = vset.pattern.permute.xlu1 %v1731_v2  ;;  %1506 = vset.pattern.permute.xlu0 %v1731_v2  ;;  %v1770_v4 = vld [vmem:[%s3096_s0 + $0x10] sm:$0xff]  ;;  %17 = vst.msk [vmem:[#allocation2 + $0x8] sm:$0xff] %vm15_vm0, %v1732_v7 }
   0x2   :  { %375 = vmax.xlane.f32.xlu1 %v1753_v0  ;;  %373 = vmax.xlane.f32.xlu0 %v1758_v1  ;;  %v1765_v3 = vld [vmem:[%s3096_s0 + $0x20] sm:$0xff]  ;;  %v1777_v5 = vld [vmem:[%s3096_s0 + $0x30] sm:$0xff]  ;;  %v1782_v6 = vld [vmem:[%s3096_s0 + $0x18] sm:$0xff]  ;;  %16 = vst.msk [vmem:[#allocation2] sm:$0xff] %vm15_vm0, %v1732_v7 }
   0x3   :  { %18 = vst.msk [vmem:[#allocation2 + $0x10] sm:$0xff] %vm15_vm0, %v1732_v7  ;;  %19 = vst.msk [vmem:[#allocation2 + $0x18] sm:$0xff] %vm15_vm0, %v1732_v7  ;;  %v1821_v8 = vld [vmem:[%s3096_s0 + $0x40] sm:$0xff]  ;;  %v1826_v9 = vld [vmem:[%s3096_s0 + $0x28] sm:$0xff] }
   0x4   :  { %20 = vst.msk [vmem:[#allocation2 + $0x20] sm:$0xff] %vm15_vm0, %v1732_v7  ;;  %21 = vst.msk [vmem:[#allocation2 + $0x28] sm:$0xff] %vm15_vm0, %v1732_v7  ;;  %v1833_v10 = vld [vmem:[%s3096_s0 + $0x50] sm:$0xff]  ;;  %v1838_v11 = vld [vmem:[%s3096_s0 + $0x38] sm:$0xff] }
   0x5   :  { %22 = vst.msk [vmem:[#allocation2 + $0x30] sm:$0xff] %vm15_vm0, %v1732_v7  ;;  %23 = vst.msk [vmem:[#allocation2 + $0x38] sm:$0xff] %vm15_vm0, %v1732_v7  ;;  %v1845_v12 = vld [vmem:[%s3096_s0 + $0x60] sm:$0xff]  ;;  %v1850_v13 = vld [vmem:[%s3096_s0 + $0x48] sm:$0xff] }
   0x6   :  { %381 = vmax.xlane.f32.xlu1 %v1765_v3  ;;  %377 = vmax.xlane.f32.xlu0 %v1770_v4  ;;  %24 = vst.msk [vmem:[#allocation2 + $0x40] sm:$0xff] %vm15_vm0, %v1732_v7  ;;  %25 = vst.msk [vmem:[#allocation2 + $0x48] sm:$0xff] %vm15_vm0, %v1732_v7  ;;  %v1857_v14 = vld [vmem:[%s3096_s0 + $0x70] sm:$0xff]  ;;  %v1862_v15 = vld [vmem:[%s3096_s0 + $0x58] sm:$0xff] }
   0x7   :  { %26 = vst.msk [vmem:[#allocation2 + $0x50] sm:$0xff] %vm15_vm0, %v1732_v7  ;;  %27 = vst.msk [vmem:[#allocation2 + $0x58] sm:$0xff] %vm15_vm0, %v1732_v7  ;;  %v1997_v17 = vld [vmem:[%s3096_s0 + $0x80] sm:$0xff]  ;;  %v2002_v18 = vld [vmem:[%s3096_s0 + $0x68] sm:$0xff] }
   0x8   :  { %28 = vst.msk [vmem:[#allocation2 + $0x60] sm:$0xff] %vm15_vm0, %v1732_v7  ;;  %29 = vst.msk [vmem:[#allocation2 + $0x68] sm:$0xff] %vm15_vm0, %v1732_v7  ;;  %v2009_v19 = vld [vmem:[%s3096_s0 + $0x90] sm:$0xff]  ;;  %v2014_v20 = vld [vmem:[%s3096_s0 + $0x78] sm:$0xff] }
   0x9   :  { %30 = vst.msk [vmem:[#allocation2 + $0x70] sm:$0xff] %vm15_vm0, %v1732_v7  ;;  %31 = vst.msk [vmem:[#allocation2 + $0x78] sm:$0xff] %vm15_vm0, %v1732_v7  ;;  %v2021_v21 = vld [vmem:[%s3096_s0 + $0xa0] sm:$0xff]  ;;  %v2026_v22 = vld [vmem:[%s3096_s0 + $0x88] sm:$0xff] }
   0xa   :  { %32 = vst.msk [vmem:[#allocation2 + $0x80] sm:$0xff] %vm15_vm0, %v1732_v7  ;;  %33 = vst.msk [vmem:[#allocation2 + $0x88] sm:$0xff] %vm15_vm0, %v1732_v7  ;;  %385 = vmax.xlane.f32.xlu1 %v1777_v5  ;;  %379 = vmax.xlane.f32.xlu0 %v1782_v6  ;;  %v2033_v23 = vld [vmem:[%s3096_s0 + $0xb0] sm:$0xff]  ;;  %v2038_v24 = vld [vmem:[%s3096_s0 + $0x98] sm:$0xff] }
   0xb   :  { %34 = vst.msk [vmem:[#allocation2 + $0x90] sm:$0xff] %vm15_vm0, %v1732_v7  ;;  %35 = vst.msk [vmem:[#allocation2 + $0x98] sm:$0xff] %vm15_vm0, %v1732_v7  ;;  %v2045_v25 = vld [vmem:[%s3096_s0 + $0xc0] sm:$0xff]  ;;  %v2050_v26 = vld [vmem:[%s3096_s0 + $0xa8] sm:$0xff] }
   0xc   :  { %36 = vst.msk [vmem:[#allocation2 + $0xa0] sm:$0xff] %vm15_vm0, %v1732_v7  ;;  %37 = vst.msk [vmem:[#allocation2 + $0xa8] sm:$0xff] %vm15_vm0, %v1732_v7  ;;  %v2057_v27 = vld [vmem:[%s3096_s0 + $0xd0] sm:$0xff]  ;;  %v2062_v28 = vld [vmem:[%s3096_s0 + $0xb8] sm:$0xff] }
   0xd   :  { %38 = vst.msk [vmem:[#allocation2 + $0xb0] sm:$0xff] %vm15_vm0, %v1732_v7  ;;  %39 = vst.msk [vmem:[#allocation2 + $0xb8] sm:$0xff] %vm15_vm0, %v1732_v7  ;;  %v2069_v29 = vld [vmem:[%s3096_s0 + $0xe0] sm:$0xff]  ;;  %v2074_v30 = vld [vmem:[%s3096_s0 + $0xc8] sm:$0xff] }
   0xe   :  { %40 = vst.msk [vmem:[#allocation2 + $0xc0] sm:$0xff] %vm15_vm0, %v1732_v7  ;;  %41 = vst.msk [vmem:[#allocation2 + $0xc8] sm:$0xff] %vm15_vm0, %v1732_v7  ;;  %389 = vmax.xlane.f32.xlu1 %v1821_v8  ;;  %383 = vmax.xlane.f32.xlu0 %v1826_v9  ;;  %v2081_v31 = vld [vmem:[%s3096_s0 + $0xf0] sm:$0xff]  ;;  %v2086_v32 = vld [vmem:[%s3096_s0 + $0xd8] sm:$0xff] }
   0xf   :  { %42 = vst.msk [vmem:[#allocation2 + $0xd0] sm:$0xff] %vm15_vm0, %v1732_v7  ;;  %43 = vst.msk [vmem:[#allocation2 + $0xd8] sm:$0xff] %vm15_vm0, %v1732_v7  ;;  %v2093_v33 = vld [vmem:[%s3096_s0 + $0xe8] sm:$0xff]  ;;  %v2099_v34 = vld [vmem:[%s3096_s0 + $0xf8] sm:$0xff] }
  0x10   :  { %44 = vst.msk [vmem:[#allocation2 + $0xe0] sm:$0xff] %vm15_vm0, %v1732_v7  ;;  %45 = vst.msk [vmem:[#allocation2 + $0xe8] sm:$0xff] %vm15_vm0, %v1732_v7  ;;  %v146_v35 = vld [vmem:[%s3097_s1 + $0x10] sm:$0xff]  ;;  %v147_v36 = vld [vmem:[%s3097_s1 + $0x18] sm:$0xff] }
  0x11   :  { %46 = vst.msk [vmem:[#allocation2 + $0xf0] sm:$0xff] %vm15_vm0, %v1732_v7  ;;  %47 = vst.msk [vmem:[#allocation2 + $0xf8] sm:$0xff] %vm15_vm0, %v1732_v7  ;;  %v149_v37 = vld [vmem:[%s3097_s1 + $0x28] sm:$0xff]  ;;  %v151_v38 = vld [vmem:[%s3097_s1 + $0x38] sm:$0xff] }
  0x12   :  { %393 = vmax.xlane.f32.xlu1 %v1833_v10  ;;  %387 = vmax.xlane.f32.xlu0 %v1838_v11  ;;  %48 = vst.msk [vmem:[#allocation3] sm:$0xff] %vm15_vm0, %v1733_v16  ;;  %49 = vst.msk [vmem:[#allocation3 + $0x8] sm:$0xff] %vm15_vm0, %v1733_v16  ;;  %v144_v39 = vld [vmem:[%s3097_s1] sm:$0xff]  ;;  %v153_v40 = vld [vmem:[%s3097_s1 + $0x48] sm:$0xff] }
  0x13   :  { %50 = vst.msk [vmem:[#allocation3 + $0x10] sm:$0xff] %vm15_vm0, %v1733_v16  ;;  %51 = vst.msk [vmem:[#allocation3 + $0x18] sm:$0xff] %vm15_vm0, %v1733_v16  ;;  %v145_v41 = vld [vmem:[%s3097_s1 + $0x8] sm:$0xff]  ;;  %v155_v42 = vld [vmem:[%s3097_s1 + $0x58] sm:$0xff] }
  0x14   :  { %52 = vst.msk [vmem:[#allocation3 + $0x20] sm:$0xff] %vm15_vm0, %v1733_v16  ;;  %53 = vst.msk [vmem:[#allocation3 + $0x28] sm:$0xff] %vm15_vm0, %v1733_v16  ;;  %v148_v43 = vld [vmem:[%s3097_s1 + $0x20] sm:$0xff]  ;;  %v157_v44 = vld [vmem:[%s3097_s1 + $0x68] sm:$0xff] }
  0x15   :  { %54 = vst.msk [vmem:[#allocation3 + $0x30] sm:$0xff] %vm15_vm0, %v1733_v16  ;;  %55 = vst.msk [vmem:[#allocation3 + $0x38] sm:$0xff] %vm15_vm0, %v1733_v16  ;;  %v150_v45 = vld [vmem:[%s3097_s1 + $0x30] sm:$0xff]  ;;  %v159_v46 = vld [vmem:[%s3097_s1 + $0x78] sm:$0xff] }
  0x16   :  { %397 = vmax.xlane.f32.xlu1 %v1845_v12  ;;  %391 = vmax.xlane.f32.xlu0 %v1850_v13  ;;  %56 = vst.msk [vmem:[#allocation3 + $0x40] sm:$0xff] %vm15_vm0, %v1733_v16  ;;  %57 = vst.msk [vmem:[#allocation3 + $0x48] sm:$0xff] %vm15_vm0, %v1733_v16  ;;  %v152_v47 = vld [vmem:[%s3097_s1 + $0x40] sm:$0xff]  ;;  %v161_v48 = vld [vmem:[%s3097_s1 + $0x88] sm:$0xff] }
  0x17   :  { %58 = vst.msk [vmem:[#allocation3 + $0x50] sm:$0xff] %vm15_vm0, %v1733_v16  ;;  %59 = vst.msk [vmem:[#allocation3 + $0x58] sm:$0xff] %vm15_vm0, %v1733_v16  ;;  %v154_v49 = vld [vmem:[%s3097_s1 + $0x50] sm:$0xff]  ;;  %v163_v50 = vld [vmem:[%s3097_s1 + $0x98] sm:$0xff] }
  0x18   :  { %60 = vst.msk [vmem:[#allocation3 + $0x60] sm:$0xff] %vm15_vm0, %v1733_v16  ;;  %61 = vst.msk [vmem:[#allocation3 + $0x68] sm:$0xff] %vm15_vm0, %v1733_v16  ;;  %v156_v51 = vld [vmem:[%s3097_s1 + $0x60] sm:$0xff]  ;;  %v165_v52 = vld [vmem:[%s3097_s1 + $0xa8] sm:$0xff] }
  0x19   :  { %62 = vst.msk [vmem:[#allocation3 + $0x70] sm:$0xff] %vm15_vm0, %v1733_v16  ;;  %63 = vst.msk [vmem:[#allocation3 + $0x78] sm:$0xff] %vm15_vm0, %v1733_v16  ;;  %v158_v53 = vld [vmem:[%s3097_s1 + $0x70] sm:$0xff]  ;;  %v167_v54 = vld [vmem:[%s3097_s1 + $0xb8] sm:$0xff] }
  0x1a   :  { %401 = vmax.xlane.f32.xlu1 %v1857_v14  ;;  %395 = vmax.xlane.f32.xlu0 %v1862_v15  ;;  %64 = vst.msk [vmem:[#allocation3 + $0x80] sm:$0xff] %vm15_vm0, %v1733_v16  ;;  %65 = vst.msk [vmem:[#allocation3 + $0x88] sm:$0xff] %vm15_vm0, %v1733_v16  ;;  %v160_v55 = vld [vmem:[%s3097_s1 + $0x80] sm:$0xff]  ;;  %v169_v56 = vld [vmem:[%s3097_s1 + $0xc8] sm:$0xff] }
  0x1b   :  { %66 = vst.msk [vmem:[#allocation3 + $0x90] sm:$0xff] %vm15_vm0, %v1733_v16  ;;  %67 = vst.msk [vmem:[#allocation3 + $0x98] sm:$0xff] %vm15_vm0, %v1733_v16  ;;  %v162_v57 = vld [vmem:[%s3097_s1 + $0x90] sm:$0xff]  ;;  %v171_v58 = vld [vmem:[%s3097_s1 + $0xd8] sm:$0xff] }
  0x1c   :  { %68 = vst.msk [vmem:[#allocation3 + $0xa0] sm:$0xff] %vm15_vm0, %v1733_v16  ;;  %69 = vst.msk [vmem:[#allocation3 + $0xa8] sm:$0xff] %vm15_vm0, %v1733_v16  ;;  %v164_v59 = vld [vmem:[%s3097_s1 + $0xa0] sm:$0xff]  ;;  %v173_v60 = vld [vmem:[%s3097_s1 + $0xe8] sm:$0xff] }
  0x1d   :  { %70 = vst.msk [vmem:[#allocation3 + $0xb0] sm:$0xff] %vm15_vm0, %v1733_v16  ;;  %71 = vst.msk [vmem:[#allocation3 + $0xb8] sm:$0xff] %vm15_vm0, %v1733_v16  ;;  %v166_v61 = vld [vmem:[%s3097_s1 + $0xb0] sm:$0xff]  ;;  %v175_v62 = vld [vmem:[%s3097_s1 + $0xf8] sm:$0xff] }
  0x1e   :  { %72 = vst.msk [vmem:[#allocation3 + $0xc0] sm:$0xff] %vm15_vm0, %v1733_v16  ;;  %73 = vst.msk [vmem:[#allocation3 + $0xc8] sm:$0xff] %vm15_vm0, %v1733_v16  ;;  %405 = vmax.xlane.f32.xlu1 %v1997_v17  ;;  %399 = vmax.xlane.f32.xlu0 %v2002_v18  ;;  %v168_v63 = vld [vmem:[%s3097_s1 + $0xc0] sm:$0xff]  ;;  %v170_v2 = vld [vmem:[%s3097_s1 + $0xd0] sm:$0xff] }
  0x1f   :  { %74 = vst.msk [vmem:[#allocation3 + $0xd0] sm:$0xff] %vm15_vm0, %v1733_v16  ;;  %75 = vst.msk [vmem:[#allocation3 + $0xd8] sm:$0xff] %vm15_vm0, %v1733_v16  ;;  %v2192_v7 = vld [vmem:[#allocation2 + $0x8] sm:$0xff] }
  0x20   :  { %76 = vst.msk [vmem:[#allocation3 + $0xe0] sm:$0xff] %vm15_vm0, %v1733_v16  ;;  %77 = vst.msk [vmem:[#allocation3 + $0xe8] sm:$0xff] %vm15_vm0, %v1733_v16 }
  0x21   :  { %78 = vst.msk [vmem:[#allocation3 + $0xf0] sm:$0xff] %vm15_vm0, %v1733_v16  ;;  %79 = vst.msk [vmem:[#allocation3 + $0xf8] sm:$0xff] %vm15_vm0, %v1733_v16 }
  0x22   :  { %80 = vst.msk [vmem:[#allocation4] sm:$0xff] %vm15_vm0, %v1733_v16  ;;  %81 = vst.msk [vmem:[#allocation4 + $0x8] sm:$0xff] %vm15_vm0, %v1733_v16  ;;  %409 = vmax.xlane.f32.xlu1 %v2009_v19  ;;  %403 = vmax.xlane.f32.xlu0 %v2014_v20 }
  0x23   :  { %82 = vst.msk [vmem:[#allocation4 + $0x10] sm:$0xff] %vm15_vm0, %v1733_v16  ;;  %83 = vst.msk [vmem:[#allocation4 + $0x18] sm:$0xff] %vm15_vm0, %v1733_v16 }
  0x24   :  { %84 = vst.msk [vmem:[#allocation4 + $0x20] sm:$0xff] %vm15_vm0, %v1733_v16  ;;  %85 = vst.msk [vmem:[#allocation4 + $0x28] sm:$0xff] %vm15_vm0, %v1733_v16 }
  0x25   :  { %86 = vst.msk [vmem:[#allocation4 + $0x30] sm:$0xff] %vm15_vm0, %v1733_v16  ;;  %87 = vst.msk [vmem:[#allocation4 + $0x38] sm:$0xff] %vm15_vm0, %v1733_v16 }
  0x26   :  { %88 = vst.msk [vmem:[#allocation4 + $0x40] sm:$0xff] %vm15_vm0, %v1733_v16  ;;  %89 = vst.msk [vmem:[#allocation4 + $0x48] sm:$0xff] %vm15_vm0, %v1733_v16  ;;  %413 = vmax.xlane.f32.xlu1 %v2021_v21  ;;  %407 = vmax.xlane.f32.xlu0 %v2026_v22 }
  0x27   :  { %90 = vst.msk [vmem:[#allocation4 + $0x50] sm:$0xff] %vm15_vm0, %v1733_v16  ;;  %91 = vst.msk [vmem:[#allocation4 + $0x58] sm:$0xff] %vm15_vm0, %v1733_v16 }
  0x28   :  { %92 = vst.msk [vmem:[#allocation4 + $0x60] sm:$0xff] %vm15_vm0, %v1733_v16  ;;  %93 = vst.msk [vmem:[#allocation4 + $0x68] sm:$0xff] %vm15_vm0, %v1733_v16 }
  0x29   :  { %94 = vst.msk [vmem:[#allocation4 + $0x70] sm:$0xff] %vm15_vm0, %v1733_v16  ;;  %95 = vst.msk [vmem:[#allocation4 + $0x78] sm:$0xff] %vm15_vm0, %v1733_v16 }
  0x2a   :  { %96 = vst.msk [vmem:[#allocation4 + $0x80] sm:$0xff] %vm15_vm0, %v1733_v16  ;;  %97 = vst.msk [vmem:[#allocation4 + $0x88] sm:$0xff] %vm15_vm0, %v1733_v16  ;;  %417 = vmax.xlane.f32.xlu1 %v2033_v23  ;;  %411 = vmax.xlane.f32.xlu0 %v2038_v24 }
  0x2b   :  { %98 = vst.msk [vmem:[#allocation4 + $0x90] sm:$0xff] %vm15_vm0, %v1733_v16  ;;  %99 = vst.msk [vmem:[#allocation4 + $0x98] sm:$0xff] %vm15_vm0, %v1733_v16 }
  0x2c   :  { %100 = vst.msk [vmem:[#allocation4 + $0xa0] sm:$0xff] %vm15_vm0, %v1733_v16  ;;  %101 = vst.msk [vmem:[#allocation4 + $0xa8] sm:$0xff] %vm15_vm0, %v1733_v16 }
  0x2d   :  { %102 = vst.msk [vmem:[#allocation4 + $0xb0] sm:$0xff] %vm15_vm0, %v1733_v16  ;;  %103 = vst.msk [vmem:[#allocation4 + $0xb8] sm:$0xff] %vm15_vm0, %v1733_v16 }
  0x2e   :  { %104 = vst.msk [vmem:[#allocation4 + $0xc0] sm:$0xff] %vm15_vm0, %v1733_v16  ;;  %105 = vst.msk [vmem:[#allocation4 + $0xc8] sm:$0xff] %vm15_vm0, %v1733_v16  ;;  %421 = vmax.xlane.f32.xlu1 %v2045_v25  ;;  %415 = vmax.xlane.f32.xlu0 %v2050_v26 }
  0x2f   :  { %106 = vst.msk [vmem:[#allocation4 + $0xd0] sm:$0xff] %vm15_vm0, %v1733_v16  ;;  %107 = vst.msk [vmem:[#allocation4 + $0xd8] sm:$0xff] %vm15_vm0, %v1733_v16 }
  0x30   :  { %108 = vst.msk [vmem:[#allocation4 + $0xe0] sm:$0xff] %vm15_vm0, %v1733_v16  ;;  %109 = vst.msk [vmem:[#allocation4 + $0xe8] sm:$0xff] %vm15_vm0, %v1733_v16 }
  0x31   :  { %110 = vst.msk [vmem:[#allocation4 + $0xf0] sm:$0xff] %vm15_vm0, %v1733_v16  ;;  %111 = vst.msk [vmem:[#allocation4 + $0xf8] sm:$0xff] %vm15_vm0, %v1733_v16  ;;  %v2194_v16 = vld [vmem:[#allocation2] sm:$0xff] }
  0x32   :  { %425 = vmax.xlane.f32.xlu1 %v2057_v27  ;;  %419 = vmax.xlane.f32.xlu0 %v2062_v28  ;;  %3163 = vst [vmem:[#allocation5_spill] sm:$0xff] %v2192_v7  ;;  %3164 = vst [vmem:[#allocation6_spill] sm:$0xff] %v2194_v16 }
  0x36   :  { %429 = vmax.xlane.f32.xlu1 %v2069_v29  ;;  %423 = vmax.xlane.f32.xlu0 %v2074_v30 }
  0x3a   :  { %433 = vmax.xlane.f32.xlu1 %v2081_v31  ;;  %427 = vmax.xlane.f32.xlu0 %v2086_v32 }
  0x3e   :  { %431 = vmax.xlane.f32.xlu0 %v2093_v33 }
  0x42   :  { %435 = vmax.xlane.f32.xlu0 %v2099_v34 }
  0x4b   :  { %188 = vperm.xlu1 %1505, %v146_v35   ;;  %v172_v35 = vld [vmem:[%s3097_s1 + $0xe0] sm:$0xff] }
  0x4f   :  { %191 = vperm.xlu1 %1505, %v147_v36  }
  0x53   :  { %197 = vperm.xlu1 %1505, %v149_v37  }
  0x57   :  { %203 = vperm.xlu1 %1505, %v151_v38  }
  0x58   :  { %182 = vperm.xlu0 %1506, %v144_v39  }
  0x5b   :  { %209 = vperm.xlu1 %1505, %v153_v40   ;;  %v2205_v40 = vld [vmem:[#allocation2 + $0x20] sm:$0xff] }
  0x5c   :  { %185 = vperm.xlu0 %1506, %v145_v41   ;;  %3167 = vst [vmem:[#allocation9_spill] sm:$0xff] %v2205_v40  ;;  %v2207_v41 = vld [vmem:[#allocation2 + $0x10] sm:$0xff] }
  0x5d   :  { %3168 = vst [vmem:[#allocation10_spill] sm:$0xff] %v2207_v41 }
  0x5f   :  { %215 = vperm.xlu1 %1505, %v155_v42   ;;  %v174_v42 = vld [vmem:[%s3097_s1 + $0xf0] sm:$0xff] }
  0x60   :  { %194 = vperm.xlu0 %1506, %v148_v43   ;;  %v2347_v43 = vld [vmem:[#allocation2 + $0x90] sm:$0xff] }
  0x61   :  { %3195 = vst [vmem:[#allocation37_spill] sm:$0xff] %v2347_v43 }
  0x63   :  { %221 = vperm.xlu1 %1505, %v157_v44  }
  0x64   :  { %200 = vperm.xlu0 %1506, %v150_v45  }
  0x67   :  { %227 = vperm.xlu1 %1505, %v159_v46  }
  0x68   :  { %206 = vperm.xlu0 %1506, %v152_v47  }
  0x6b   :  { %233 = vperm.xlu1 %1505, %v161_v48  }
  0x6c   :  { %212 = vperm.xlu0 %1506, %v154_v49   ;;  %v2227_v49 = vld [vmem:[#allocation2 + $0x30] sm:$0xff] }
  0x6d   :  { %3171 = vst [vmem:[#allocation13_spill] sm:$0xff] %v2227_v49 }
  0x6f   :  { %239 = vperm.xlu1 %1505, %v163_v50   ;;  %v2229_v50 = vld [vmem:[#allocation2 + $0x18] sm:$0xff] }
  0x70   :  { %218 = vperm.xlu0 %1506, %v156_v51   ;;  %3172 = vst [vmem:[#allocation14_spill] sm:$0xff] %v2229_v50 }
  0x73   :  { %245 = vperm.xlu1 %1505, %v165_v52  }
  0x74   :  { %224 = vperm.xlu0 %1506, %v158_v53  }
  0x77   :  { %251 = vperm.xlu1 %1505, %v167_v54  }
  0x78   :  { %230 = vperm.xlu0 %1506, %v160_v55  }
  0x7b   :  { %257 = vperm.xlu1 %1505, %v169_v56  }
  0x7c   :  { %236 = vperm.xlu0 %1506, %v162_v57   ;;  %v2247_v57 = vld [vmem:[#allocation2 + $0x40] sm:$0xff] }
  0x7d   :  { %3175 = vst [vmem:[#allocation17_spill] sm:$0xff] %v2247_v57 }
  0x7f   :  { %263 = vperm.xlu1 %1505, %v171_v58   ;;  %v2249_v58 = vld [vmem:[#allocation2 + $0x28] sm:$0xff] }
  0x80   :  { %242 = vperm.xlu0 %1506, %v164_v59   ;;  %3176 = vst [vmem:[#allocation18_spill] sm:$0xff] %v2249_v58  ;;  %v2327_v59 = vld [vmem:[#allocation2 + $0x80] sm:$0xff] }
  0x81   :  { %3191 = vst [vmem:[#allocation33_spill] sm:$0xff] %v2327_v59 }
  0x83   :  { %269 = vperm.xlu1 %1505, %v173_v60   ;;  %v2309_v60 = vld [vmem:[#allocation2 + $0x58] sm:$0xff] }
  0x84   :  { %248 = vperm.xlu0 %1506, %v166_v61   ;;  %3188 = vst [vmem:[#allocation30_spill] sm:$0xff] %v2309_v60 }
  0x87   :  { %275 = vperm.xlu1 %1505, %v175_v62  }
  0x88   :  { %254 = vperm.xlu0 %1506, %v168_v63  }
  0x8c   :  { %260 = vperm.xlu0 %1506, %v170_v2  }
  0x8f   :  { %v376_v36 = vpop.xlane.xlu1 %375  ;;  %v374_v37 = vpop.xlane.xlu0 %373 }
  0x90   :  { %v2200_v38 = vmax.f32 %v2192_v7, %v376_v36  ;;  %v2203_v39 = vmax.f32 %v2194_v16, %v374_v37  ;;  %266 = vperm.xlu0 %1506, %v172_v35   ;;  %v2267_v35 = vld [vmem:[#allocation2 + $0x50] sm:$0xff]  ;;  %v2269_v36 = vld [vmem:[#allocation2 + $0x38] sm:$0xff] }
  0x91   :  { %3179 = vst [vmem:[#allocation21_spill] sm:$0xff] %v2267_v35  ;;  %3180 = vst [vmem:[#allocation22_spill] sm:$0xff] %v2269_v36  ;;  %v2307_v37 = vld [vmem:[#allocation2 + $0x70] sm:$0xff] }
  0x92   :  { %3165 = vst [vmem:[#allocation7_spill] sm:$0xff] %v2200_v38  ;;  %3166 = vst [vmem:[#allocation8_spill] sm:$0xff] %v2203_v39  ;;  %631 = vperm.xlu1 %1505, %v2203_v39  }
  0x93   :  { %1207 = vst.msk [vmem:[#allocation2 + $0x8] sm:$0xff] %vm15_vm0, %v2200_v38  ;;  %1206 = vst.msk [vmem:[#allocation2] sm:$0xff] %vm15_vm0, %v2203_v39  ;;  %v382_v45 = vpop.xlane.xlu1 %381  ;;  %v378_v46 = vpop.xlane.xlu0 %377 }
  0x94   :  { %v2222_v47 = vmax.f32 %v2205_v40, %v382_v45  ;;  %v2225_v48 = vmax.f32 %v2207_v41, %v378_v46  ;;  %272 = vperm.xlu0 %1506, %v174_v42   ;;  %3187 = vst [vmem:[#allocation29_spill] sm:$0xff] %v2307_v37 }
  0x96   :  { %3169 = vst [vmem:[#allocation11_spill] sm:$0xff] %v2222_v47  ;;  %3170 = vst [vmem:[#allocation12_spill] sm:$0xff] %v2225_v48  ;;  %641 = vperm.xlu1 %1505, %v2225_v48  }
  0x97   :  { %1210 = vst.msk [vmem:[#allocation2 + $0x20] sm:$0xff] %vm15_vm0, %v2222_v47  ;;  %1208 = vst.msk [vmem:[#allocation2 + $0x10] sm:$0xff] %vm15_vm0, %v2225_v48  ;;  %v386_v53 = vpop.xlane.xlu1 %385  ;;  %v380_v54 = vpop.xlane.xlu0 %379 }
  0x98   :  { %v2241_v55 = vmax.f32 %v2227_v49, %v386_v53  ;;  %v2244_v56 = vmax.f32 %v2229_v50, %v380_v54  ;;  %636 = vperm.xlu0 %1506, %v2200_v38  }
  0x9a   :  { %3173 = vst [vmem:[#allocation15_spill] sm:$0xff] %v2241_v55  ;;  %3174 = vst [vmem:[#allocation16_spill] sm:$0xff] %v2244_v56  ;;  %646 = vperm.xlu1 %1505, %v2244_v56  }
  0x9b   :  { %1212 = vst.msk [vmem:[#allocation2 + $0x30] sm:$0xff] %vm15_vm0, %v2241_v55  ;;  %1209 = vst.msk [vmem:[#allocation2 + $0x18] sm:$0xff] %vm15_vm0, %v2244_v56  ;;  %v390_v61 = vpop.xlane.xlu1 %389  ;;  %v384_v62 = vpop.xlane.xlu0 %383 }
  0x9c   :  { %v2261_v63 = vmax.f32 %v2247_v57, %v390_v61  ;;  %v2264_v2 = vmax.f32 %v2249_v58, %v384_v62  ;;  %651 = vperm.xlu0 %1506, %v2222_v47   ;;  %v2287_v61 = vld [vmem:[#allocation2 + $0x60] sm:$0xff]  ;;  %v2289_v62 = vld [vmem:[#allocation2 + $0x48] sm:$0xff] }
  0x9d   :  { %3183 = vst [vmem:[#allocation25_spill] sm:$0xff] %v2287_v61  ;;  %3184 = vst [vmem:[#allocation26_spill] sm:$0xff] %v2289_v62 }
  0x9e   :  { %3177 = vst [vmem:[#allocation19_spill] sm:$0xff] %v2261_v63  ;;  %3178 = vst [vmem:[#allocation20_spill] sm:$0xff] %v2264_v2  ;;  %656 = vperm.xlu1 %1505, %v2264_v2  }
  0x9f   :  { %1214 = vst.msk [vmem:[#allocation2 + $0x40] sm:$0xff] %vm15_vm0, %v2261_v63  ;;  %1211 = vst.msk [vmem:[#allocation2 + $0x28] sm:$0xff] %vm15_vm0, %v2264_v2  ;;  %v394_v45 = vpop.xlane.xlu1 %393  ;;  %v388_v46 = vpop.xlane.xlu0 %387 }
  0xa0   :  { %v2281_v53 = vmax.f32 %v2267_v35, %v394_v45  ;;  %v2284_v54 = vmax.f32 %v2269_v36, %v388_v46  ;;  %661 = vperm.xlu0 %1506, %v2241_v55   ;;  %v2367_v35 = vld [vmem:[#allocation2 + $0xa0] sm:$0xff] }
  0xa1   :  { %3199 = vst [vmem:[#allocation41_spill] sm:$0xff] %v2367_v35 }
  0xa2   :  { %3181 = vst [vmem:[#allocation23_spill] sm:$0xff] %v2281_v53  ;;  %3182 = vst [vmem:[#allocation24_spill] sm:$0xff] %v2284_v54  ;;  %666 = vperm.xlu1 %1505, %v2284_v54  }
  0xa3   :  { %1216 = vst.msk [vmem:[#allocation2 + $0x50] sm:$0xff] %vm15_vm0, %v2281_v53  ;;  %1213 = vst.msk [vmem:[#allocation2 + $0x38] sm:$0xff] %vm15_vm0, %v2284_v54  ;;  %v398_v45 = vpop.xlane.xlu1 %397  ;;  %v392_v46 = vpop.xlane.xlu0 %391 }
  0xa4   :  { %v2301_v42 = vmax.f32 %v2287_v61, %v398_v45  ;;  %v2304_v51 = vmax.f32 %v2289_v62, %v392_v46  ;;  %671 = vperm.xlu0 %1506, %v2261_v63   ;;  %v2329_v61 = vld [vmem:[#allocation2 + $0x68] sm:$0xff] }
  0xa5   :  { %3192 = vst [vmem:[#allocation34_spill] sm:$0xff] %v2329_v61 }
  0xa6   :  { %3185 = vst [vmem:[#allocation27_spill] sm:$0xff] %v2301_v42  ;;  %3186 = vst [vmem:[#allocation28_spill] sm:$0xff] %v2304_v51  ;;  %676 = vperm.xlu1 %1505, %v2304_v51  }
  0xa7   :  { %1218 = vst.msk [vmem:[#allocation2 + $0x60] sm:$0xff] %vm15_vm0, %v2301_v42  ;;  %1215 = vst.msk [vmem:[#allocation2 + $0x48] sm:$0xff] %vm15_vm0, %v2304_v51  ;;  %v402_v45 = vpop.xlane.xlu1 %401  ;;  %v396_v46 = vpop.xlane.xlu0 %395 }
  0xa8   :  { %v2321_v52 = vmax.f32 %v2307_v37, %v402_v45  ;;  %v2324_v44 = vmax.f32 %v2309_v60, %v396_v46  ;;  %681 = vperm.xlu0 %1506, %v2281_v53   ;;  %v2349_v37 = vld [vmem:[#allocation2 + $0x78] sm:$0xff] }
  0xa9   :  { %3196 = vst [vmem:[#allocation38_spill] sm:$0xff] %v2349_v37 }
  0xaa   :  { %3189 = vst [vmem:[#allocation31_spill] sm:$0xff] %v2321_v52  ;;  %3190 = vst [vmem:[#allocation32_spill] sm:$0xff] %v2324_v44  ;;  %686 = vperm.xlu1 %1505, %v2324_v44  }
  0xab   :  { %1220 = vst.msk [vmem:[#allocation2 + $0x70] sm:$0xff] %vm15_vm0, %v2321_v52  ;;  %1217 = vst.msk [vmem:[#allocation2 + $0x58] sm:$0xff] %vm15_vm0, %v2324_v44  ;;  %v406_v45 = vpop.xlane.xlu1 %405  ;;  %v400_v46 = vpop.xlane.xlu0 %399  ;;  %v2387_v44 = vld [vmem:[#allocation2 + $0xb0] sm:$0xff] }
  0xac   :  { %v2341_v53 = vmax.f32 %v2327_v59, %v406_v45  ;;  %v2344_v51 = vmax.f32 %v2329_v61, %v400_v46  ;;  %691 = vperm.xlu0 %1506, %v2301_v42   ;;  %v2369_v59 = vld [vmem:[#allocation2 + $0x88] sm:$0xff]  ;;  %3203 = vst [vmem:[#allocation45_spill] sm:$0xff] %v2387_v44 }
  0xad   :  { %3200 = vst [vmem:[#allocation42_spill] sm:$0xff] %v2369_v59 }
  0xae   :  { %3193 = vst [vmem:[#allocation35_spill] sm:$0xff] %v2341_v53  ;;  %3194 = vst [vmem:[#allocation36_spill] sm:$0xff] %v2344_v51  ;;  %696 = vperm.xlu1 %1505, %v2344_v51  }
  0xaf   :  { %1222 = vst.msk [vmem:[#allocation2 + $0x80] sm:$0xff] %vm15_vm0, %v2341_v53  ;;  %1219 = vst.msk [vmem:[#allocation2 + $0x68] sm:$0xff] %vm15_vm0, %v2344_v51  ;;  %v410_v45 = vpop.xlane.xlu1 %409  ;;  %v404_v46 = vpop.xlane.xlu0 %403  ;;  %v2407_v51 = vld [vmem:[#allocation2 + $0xc0] sm:$0xff] }
  0xb0   :  { %v2361_v42 = vmax.f32 %v2347_v43, %v410_v45  ;;  %v2364_v60 = vmax.f32 %v2349_v37, %v404_v46  ;;  %701 = vperm.xlu0 %1506, %v2321_v52   ;;  %v2389_v43 = vld [vmem:[#allocation2 + $0x98] sm:$0xff]  ;;  %3207 = vst [vmem:[#allocation49_spill] sm:$0xff] %v2407_v51 }
  0xb1   :  { %3204 = vst [vmem:[#allocation46_spill] sm:$0xff] %v2389_v43 }
  0xb2   :  { %3197 = vst [vmem:[#allocation39_spill] sm:$0xff] %v2361_v42  ;;  %3198 = vst [vmem:[#allocation40_spill] sm:$0xff] %v2364_v60  ;;  %706 = vperm.xlu1 %1505, %v2364_v60  }
  0xb3   :  { %1224 = vst.msk [vmem:[#allocation2 + $0x90] sm:$0xff] %vm15_vm0, %v2361_v42  ;;  %1221 = vst.msk [vmem:[#allocation2 + $0x78] sm:$0xff] %vm15_vm0, %v2364_v60  ;;  %v414_v45 = vpop.xlane.xlu1 %413  ;;  %v408_v46 = vpop.xlane.xlu0 %407  ;;  %v2427_v60 = vld [vmem:[#allocation2 + $0xd0] sm:$0xff] }
  0xb4   :  { %v2381_v52 = vmax.f32 %v2367_v35, %v414_v45  ;;  %v2384_v61 = vmax.f32 %v2369_v59, %v408_v46  ;;  %711 = vperm.xlu0 %1506, %v2341_v53   ;;  %v2409_v35 = vld [vmem:[#allocation2 + $0xa8] sm:$0xff]  ;;  %3211 = vst [vmem:[#allocation53_spill] sm:$0xff] %v2427_v60 }
  0xb5   :  { %3208 = vst [vmem:[#allocation50_spill] sm:$0xff] %v2409_v35 }
  0xb6   :  { %3201 = vst [vmem:[#allocation43_spill] sm:$0xff] %v2381_v52  ;;  %3202 = vst [vmem:[#allocation44_spill] sm:$0xff] %v2384_v61  ;;  %716 = vperm.xlu1 %1505, %v2384_v61  }
  0xb7   :  { %1226 = vst.msk [vmem:[#allocation2 + $0xa0] sm:$0xff] %vm15_vm0, %v2381_v52  ;;  %1223 = vst.msk [vmem:[#allocation2 + $0x88] sm:$0xff] %vm15_vm0, %v2384_v61  ;;  %v418_v45 = vpop.xlane.xlu1 %417  ;;  %v412_v46 = vpop.xlane.xlu0 %411  ;;  %v2447_v61 = vld [vmem:[#allocation2 + $0xe0] sm:$0xff] }
  0xb8   :  { %v2401_v53 = vmax.f32 %v2387_v44, %v418_v45  ;;  %v2404_v37 = vmax.f32 %v2389_v43, %v412_v46  ;;  %721 = vperm.xlu0 %1506, %v2361_v42   ;;  %v2429_v44 = vld [vmem:[#allocation2 + $0xb8] sm:$0xff]  ;;  %3215 = vst [vmem:[#allocation57_spill] sm:$0xff] %v2447_v61 }
  0xb9   :  { %3212 = vst [vmem:[#allocation54_spill] sm:$0xff] %v2429_v44 }
  0xba   :  { %3205 = vst [vmem:[#allocation47_spill] sm:$0xff] %v2401_v53  ;;  %3206 = vst [vmem:[#allocation48_spill] sm:$0xff] %v2404_v37  ;;  %726 = vperm.xlu1 %1505, %v2404_v37  }
  0xbb   :  { %1228 = vst.msk [vmem:[#allocation2 + $0xb0] sm:$0xff] %vm15_vm0, %v2401_v53  ;;  %1225 = vst.msk [vmem:[#allocation2 + $0x98] sm:$0xff] %vm15_vm0, %v2404_v37  ;;  %v422_v45 = vpop.xlane.xlu1 %421  ;;  %v416_v46 = vpop.xlane.xlu0 %415  ;;  %v2467_v37 = vld [vmem:[#allocation2 + $0xf0] sm:$0xff] }
  0xbc   :  { %v2421_v42 = vmax.f32 %v2407_v51, %v422_v45  ;;  %v2424_v59 = vmax.f32 %v2409_v35, %v416_v46  ;;  %731 = vperm.xlu0 %1506, %v2381_v52   ;;  %v2449_v51 = vld [vmem:[#allocation2 + $0xc8] sm:$0xff]  ;;  %3219 = vst [vmem:[#allocation61_spill] sm:$0xff] %v2467_v37 }
  0xbd   :  { %3216 = vst [vmem:[#allocation58_spill] sm:$0xff] %v2449_v51 }
  0xbe   :  { %3209 = vst [vmem:[#allocation51_spill] sm:$0xff] %v2421_v42  ;;  %3210 = vst [vmem:[#allocation52_spill] sm:$0xff] %v2424_v59  ;;  %736 = vperm.xlu1 %1505, %v2424_v59  }
  0xbf   :  { %1230 = vst.msk [vmem:[#allocation2 + $0xc0] sm:$0xff] %vm15_vm0, %v2421_v42  ;;  %1227 = vst.msk [vmem:[#allocation2 + $0xa8] sm:$0xff] %vm15_vm0, %v2424_v59  ;;  %v426_v45 = vpop.xlane.xlu1 %425  ;;  %v420_v46 = vpop.xlane.xlu0 %419  ;;  %v2487_v59 = vld [vmem:[#allocation2 + $0xe8] sm:$0xff] }
  0xc0   :  { %v2441_v52 = vmax.f32 %v2427_v60, %v426_v45  ;;  %v2444_v43 = vmax.f32 %v2429_v44, %v420_v46  ;;  %741 = vperm.xlu0 %1506, %v2401_v53   ;;  %v2469_v60 = vld [vmem:[#allocation2 + $0xd8] sm:$0xff]  ;;  %3223 = vst [vmem:[#allocation65_spill] sm:$0xff] %v2487_v59 }
  0xc1   :  { %3220 = vst [vmem:[#allocation62_spill] sm:$0xff] %v2469_v60 }
  0xc2   :  { %3213 = vst [vmem:[#allocation55_spill] sm:$0xff] %v2441_v52  ;;  %3214 = vst [vmem:[#allocation56_spill] sm:$0xff] %v2444_v43  ;;  %746 = vperm.xlu1 %1505, %v2444_v43  }
  0xc3   :  { %1232 = vst.msk [vmem:[#allocation2 + $0xd0] sm:$0xff] %vm15_vm0, %v2441_v52  ;;  %1229 = vst.msk [vmem:[#allocation2 + $0xb8] sm:$0xff] %vm15_vm0, %v2444_v43  ;;  %v430_v45 = vpop.xlane.xlu1 %429  ;;  %v424_v46 = vpop.xlane.xlu0 %423  ;;  %v2504_v43 = vld [vmem:[#allocation2 + $0xf8] sm:$0xff] }
  0xc4   :  { %v2461_v53 = vmax.f32 %v2447_v61, %v430_v45  ;;  %v2464_v35 = vmax.f32 %v2449_v51, %v424_v46  ;;  %751 = vperm.xlu0 %1506, %v2421_v42   ;;  %3225 = vst [vmem:[#allocation67_spill] sm:$0xff] %v2504_v43 }
  0xc6   :  { %3217 = vst [vmem:[#allocation59_spill] sm:$0xff] %v2461_v53  ;;  %3218 = vst [vmem:[#allocation60_spill] sm:$0xff] %v2464_v35  ;;  %756 = vperm.xlu1 %1505, %v2464_v35  }
  0xc7   :  { %1234 = vst.msk [vmem:[#allocation2 + $0xe0] sm:$0xff] %vm15_vm0, %v2461_v53  ;;  %1231 = vst.msk [vmem:[#allocation2 + $0xc8] sm:$0xff] %vm15_vm0, %v2464_v35  ;;  %v434_v45 = vpop.xlane.xlu1 %433  ;;  %v428_v46 = vpop.xlane.xlu0 %427 }
  0xc8   :  { %v2481_v42 = vmax.f32 %v2467_v37, %v434_v45  ;;  %v2484_v44 = vmax.f32 %v2469_v60, %v428_v46  ;;  %761 = vperm.xlu0 %1506, %v2441_v52  }
  0xca   :  { %3221 = vst [vmem:[#allocation63_spill] sm:$0xff] %v2481_v42  ;;  %3222 = vst [vmem:[#allocation64_spill] sm:$0xff] %v2484_v44  ;;  %766 = vperm.xlu1 %1505, %v2484_v44  }
  0xcb   :  { %1236 = vst.msk [vmem:[#allocation2 + $0xf0] sm:$0xff] %vm15_vm0, %v2481_v42  ;;  %1233 = vst.msk [vmem:[#allocation2 + $0xd8] sm:$0xff] %vm15_vm0, %v2484_v44  ;;  %v2498_v45 = vpop.permute.xlu1 %188  ;;  %v432_v46 = vpop.xlane.xlu0 %431 }
  0xcc   :  { %v2501_v52 = vmax.f32 %v2487_v59, %v432_v46  ;;  %771 = vperm.xlu0 %1506, %v2461_v53  }
  0xce   :  { %3224 = vst [vmem:[#allocation66_spill] sm:$0xff] %v2501_v52  ;;  %1235 = vst.msk [vmem:[#allocation2 + $0xe8] sm:$0xff] %vm15_vm0, %v2501_v52  ;;  %776 = vperm.xlu1 %1505, %v2501_v52  }
  0xcf   :  { %v2511_v61 = vpop.permute.xlu1 %191  ;;  %v436_v44 = vpop.xlane.xlu0 %435 }
  0xd0   :  { %v2514_v60 = vmax.f32 %v2504_v43, %v436_v44  ;;  %781 = vperm.xlu0 %1506, %v2481_v42  }
  0xd2   :  { %3226 = vst [vmem:[#allocation68_spill] sm:$0xff] %v2514_v60  ;;  %1237 = vst.msk [vmem:[#allocation2 + $0xf8] sm:$0xff] %vm15_vm0, %v2514_v60  ;;  %786 = vperm.xlu1 %1505, %v2514_v60  }
  0xd3   :  { %v2522_v37 = vpop.permute.xlu1 %197 }
  0xd7   :  { %v2524_v59 = vpop.permute.xlu1 %203  ;;  %v2526_v52 = vpop.permute.xlu0 %182 }
  0xdb   :  { %v2528_v53 = vpop.permute.xlu1 %209  ;;  %v2530_v44 = vpop.permute.xlu0 %185 }
  0xdf   :  { %v2532_v35 = vpop.permute.xlu1 %215  ;;  %v2534_v42 = vpop.permute.xlu0 %194 }
  0xe3   :  { %v2536_v46 = vpop.permute.xlu1 %221  ;;  %v2538_v43 = vpop.permute.xlu0 %200 }
  0xe7   :  { %v2540_v51 = vpop.permute.xlu1 %227  ;;  %v2542_v60 = vpop.permute.xlu0 %206 }
  0xeb   :  { %v2544_v62 = vpop.permute.xlu1 %233  ;;  %v2546_v63 = vpop.permute.xlu0 %212 }
  0xef   :  { %v2548_v57 = vpop.permute.xlu1 %239  ;;  %v2550_v54 = vpop.permute.xlu0 %218 }
  0xf0   :  { %3227 = vst [vmem:[#allocation69_spill] sm:$0xff] %v2548_v57 }
  0xf3   :  { %v2552_v36 = vpop.permute.xlu1 %245  ;;  %v2554_v55 = vpop.permute.xlu0 %224 }
  0xf4   :  { %3228 = vst [vmem:[#allocation70_spill] sm:$0xff] %v2552_v36 }
  0xf7   :  { %v2556_v49 = vpop.permute.xlu1 %251  ;;  %v2558_v2 = vpop.permute.xlu0 %230 }
  0xf8   :  { %3229 = vst [vmem:[#allocation71_spill] sm:$0xff] %v2556_v49 }
  0xfb   :  { %v2560_v58 = vpop.permute.xlu1 %257  ;;  %v2562_v47 = vpop.permute.xlu0 %236 }
  0xfc   :  { %3230 = vst [vmem:[#allocation72_spill] sm:$0xff] %v2560_v58  ;;  %3231 = vst [vmem:[#allocation73_spill] sm:$0xff] %v2562_v47 }
  0xff   :  { %v2564_v40 = vpop.permute.xlu0 %242  ;;  %v2566_v56 = vpop.permute.xlu1 %263 }
 0x100   :  { %3232 = vst [vmem:[#allocation74_spill] sm:$0xff] %v2564_v40  ;;  %3233 = vst [vmem:[#allocation75_spill] sm:$0xff] %v2566_v56 }
 0x103   :  { %v2568_v50 = vpop.permute.xlu0 %248  ;;  %v2570_v38 = vpop.permute.xlu1 %269 }
 0x104   :  { %3234 = vst [vmem:[#allocation76_spill] sm:$0xff] %v2568_v50  ;;  %3235 = vst [vmem:[#allocation77_spill] sm:$0xff] %v2570_v38 }
 0x107   :  { %v2572_v7 = vpop.permute.xlu0 %254  ;;  %v2576_v41 = vpop.permute.xlu1 %275 }
 0x108   :  { %3236 = vst [vmem:[#allocation78_spill] sm:$0xff] %v2572_v7  ;;  %3238 = vst [vmem:[#allocation80_spill] sm:$0xff] %v2576_v41 }
 0x10b   :  { %v2574_v48 = vpop.permute.xlu0 %260 }
 0x10c   :  { %3237 = vst [vmem:[#allocation79_spill] sm:$0xff] %v2574_v48 }
 0x10f   :  { %v2578_v39 = vpop.permute.xlu0 %266 }
 0x110   :  { %3239 = vst [vmem:[#allocation81_spill] sm:$0xff] %v2578_v39 }
 0x111   :  { %v632_v16 = vpop.permute.xlu1 %631 }
 0x112   :  { %v789_v58 = vsub.f32 %v1758_v1, %v632_v16 }
 0x113   :  { %v2581_v49 = vpop.permute.xlu0 %272 }
 0x114   :  { %v821_v36 = vmul.f32 1.442695, %v789_v58 }
 0x115   :  { %v642_v40 = vpop.permute.xlu1 %641 }
 0x116   :  { %1507 = vpow2.f32 %v821_v36  ;;  %v791_v56 = vsub.f32 %v1770_v4, %v642_v40 }
 0x117   :  { %v637_v50 = vpop.permute.xlu0 %636 }
 0x118   :  { %v825_v38 = vmul.f32 1.442695, %v791_v56  ;;  %v790_v7 = vsub.f32 %v1753_v0, %v637_v50 }
 0x119   :  { %v647_v57 = vpop.permute.xlu1 %646 }
 0x11a   :  { %1509 = vpow2.f32 %v825_v38  ;;  %v823_v48 = vmul.f32 1.442695, %v790_v7  ;;  %v792_v41 = vsub.f32 %v1782_v6, %v647_v57 }
 0x11b   :  { %v652_v39 = vpop.permute.xlu0 %651 }
 0x11c   :  { %1511 = vpow2.f32 %v823_v48  ;;  %v827_v47 = vmul.f32 1.442695, %v792_v41  ;;  %v793_v1 = vsub.f32 %v1765_v3, %v652_v39 }
 0x11d   :  { %v657_v16 = vpop.permute.xlu1 %656 }
 0x11e   :  { %1513 = vpow2.f32 %v827_v47  ;;  %v829_v58 = vmul.f32 1.442695, %v793_v1  ;;  %v794_v36 = vsub.f32 %v1826_v9, %v657_v16 }
 0x11f   :  { %v662_v4 = vpop.permute.xlu0 %661 }
 0x120   :  { %v1508_v40 = vpop.eup %1507  ;;  %1515 = vpow2.f32 %v829_v58  ;;  %v831_v56 = vmul.f32 1.442695, %v794_v36  ;;  %v795_v0 = vsub.f32 %v1777_v5, %v662_v4 }
 0x121   :  { %885 = vadd.xlane.f32.xlu0 %v1508_v40  ;;  %v667_v7 = vpop.permute.xlu1 %666 }
 0x122   :  { %1517 = vpow2.f32 %v831_v56  ;;  %v833_v6 = vmul.f32 1.442695, %v795_v0  ;;  %v796_v38 = vsub.f32 %v1838_v11, %v667_v7 }
 0x123   :  { %v672_v41 = vpop.permute.xlu0 %671 }
 0x124   :  { %v1510_v48 = vpop.eup %1509  ;;  %1519 = vpow2.f32 %v833_v6  ;;  %v835_v3 = vmul.f32 1.442695, %v796_v38  ;;  %v797_v39 = vsub.f32 %v1821_v8, %v672_v41 }
 0x125   :  { %889 = vadd.xlane.f32.xlu0 %v1510_v48  ;;  %v677_v9 = vpop.permute.xlu1 %676 }
 0x126   :  { %v1512_v47 = vpop.eup %1511  ;;  %1521 = vpow2.f32 %v835_v3  ;;  %v837_v50 = vmul.f32 1.442695, %v797_v39  ;;  %v798_v57 = vsub.f32 %v1850_v13, %v677_v9 }
 0x127   :  { %887 = vadd.xlane.f32.xlu1 %v1512_v47  ;;  %v682_v5 = vpop.permute.xlu0 %681 }
 0x128   :  { %v1514_v1 = vpop.eup %1513  ;;  %1523 = vpow2.f32 %v837_v50  ;;  %v839_v16 = vmul.f32 1.442695, %v798_v57  ;;  %v799_v11 = vsub.f32 %v1833_v10, %v682_v5 }
 0x129   :  { %891 = vadd.xlane.f32.xlu0 %v1514_v1  ;;  %v687_v58 = vpop.permute.xlu1 %686 }
 0x12a   :  { %v1516_v36 = vpop.eup %1515  ;;  %1525 = vpow2.f32 %v839_v16  ;;  %v841_v4 = vmul.f32 1.442695, %v799_v11  ;;  %v800_v8 = vsub.f32 %v1862_v15, %v687_v58 }
 0x12b   :  { %893 = vadd.xlane.f32.xlu1 %v1516_v36  ;;  %v692_v40 = vpop.permute.xlu0 %691 }
 0x12c   :  { %v1518_v56 = vpop.eup %1517  ;;  %1527 = vpow2.f32 %v841_v4  ;;  %v843_v0 = vmul.f32 1.442695, %v800_v8  ;;  %v801_v13 = vsub.f32 %v1845_v12, %v692_v40 }
 0x12d   :  { %895 = vadd.xlane.f32.xlu0 %v1518_v56  ;;  %v697_v7 = vpop.permute.xlu1 %696 }
 0x12e   :  { %v1520_v6 = vpop.eup %1519  ;;  %1529 = vpow2.f32 %v843_v0  ;;  %v845_v38 = vmul.f32 1.442695, %v801_v13  ;;  %v802_v10 = vsub.f32 %v2002_v18, %v697_v7 }
 0x12f   :  { %897 = vadd.xlane.f32.xlu1 %v1520_v6  ;;  %v702_v41 = vpop.permute.xlu0 %701 }
 0x130   :  { %v1522_v48 = vpop.eup %1521  ;;  %1531 = vpow2.f32 %v845_v38  ;;  %v847_v3 = vmul.f32 1.442695, %v802_v10  ;;  %v803_v15 = vsub.f32 %v1857_v14, %v702_v41 }
 0x131   :  { %899 = vadd.xlane.f32.xlu0 %v1522_v48  ;;  %v707_v39 = vpop.permute.xlu1 %706 }
 0x132   :  { %v1524_v9 = vpop.eup %1523  ;;  %1533 = vpow2.f32 %v847_v3  ;;  %v849_v47 = vmul.f32 1.442695, %v803_v15  ;;  %v804_v12 = vsub.f32 %v2014_v20, %v707_v39 }
 0x133   :  { %901 = vadd.xlane.f32.xlu1 %v1524_v9  ;;  %v712_v50 = vpop.permute.xlu0 %711 }
 0x134   :  { %v1526_v57 = vpop.eup %1525  ;;  %1535 = vpow2.f32 %v849_v47  ;;  %v851_v5 = vmul.f32 1.442695, %v804_v12  ;;  %v805_v18 = vsub.f32 %v1997_v17, %v712_v50 }
 0x135   :  { %903 = vadd.xlane.f32.xlu0 %v1526_v57  ;;  %v717_v1 = vpop.permute.xlu1 %716 }
 0x136   :  { %v1528_v16 = vpop.eup %1527  ;;  %1537 = vpow2.f32 %v851_v5  ;;  %v853_v11 = vmul.f32 1.442695, %v805_v18  ;;  %v806_v14 = vsub.f32 %v2026_v22, %v717_v1 }
 0x137   :  { %905 = vadd.xlane.f32.xlu1 %v1528_v16  ;;  %v722_v58 = vpop.permute.xlu0 %721 }
 0x138   :  { %v1530_v36 = vpop.eup %1529  ;;  %1539 = vpow2.f32 %v853_v11  ;;  %v855_v4 = vmul.f32 1.442695, %v806_v14  ;;  %v807_v20 = vsub.f32 %v2009_v19, %v722_v58 }
 0x139   :  { %907 = vadd.xlane.f32.xlu0 %v1530_v36  ;;  %v727_v8 = vpop.permute.xlu1 %726 }
 0x13a   :  { %v1532_v40 = vpop.eup %1531  ;;  %1541 = vpow2.f32 %v855_v4  ;;  %v857_v56 = vmul.f32 1.442695, %v807_v20  ;;  %v808_v17 = vsub.f32 %v2038_v24, %v727_v8 }
 0x13b   :  { %909 = vadd.xlane.f32.xlu1 %v1532_v40  ;;  %v732_v0 = vpop.permute.xlu0 %731 }
 0x13c   :  { %v1534_v13 = vpop.eup %1533  ;;  %1543 = vpow2.f32 %v857_v56  ;;  %v859_v7 = vmul.f32 1.442695, %v808_v17  ;;  %v809_v22 = vsub.f32 %v2021_v21, %v732_v0 }
 0x13d   :  { %911 = vadd.xlane.f32.xlu0 %v1534_v13  ;;  %v737_v6 = vpop.permute.xlu1 %736 }
 0x13e   :  { %v1536_v38 = vpop.eup %1535  ;;  %1545 = vpow2.f32 %v859_v7  ;;  %v861_v10 = vmul.f32 1.442695, %v809_v22  ;;  %v810_v19 = vsub.f32 %v2050_v26, %v737_v6 }
 0x13f   :  { %913 = vadd.xlane.f32.xlu1 %v1536_v38  ;;  %v742_v41 = vpop.permute.xlu0 %741 }
 0x140   :  { %v1538_v48 = vpop.eup %1537  ;;  %1547 = vpow2.f32 %v861_v10  ;;  %v863_v3 = vmul.f32 1.442695, %v810_v19  ;;  %v811_v24 = vsub.f32 %v2033_v23, %v742_v41  ;;  %v176_v41 = vlaneseq }
 0x141   :  { %915 = vadd.xlane.f32.xlu0 %v1538_v48  ;;  %v747_v15 = vpop.permute.xlu1 %746 }
 0x142   :  { %v1540_v39 = vpop.eup %1539  ;;  %1549 = vpow2.f32 %v863_v3  ;;  %v865_v9 = vmul.f32 1.442695, %v811_v24  ;;  %v812_v21 = vsub.f32 %v2062_v28, %v747_v15  ;;  %v2614_v3 = vand.u32 127, %v176_v41 }
 0x143   :  { %917 = vadd.xlane.f32.xlu1 %v1540_v39  ;;  %v752_v47 = vpop.permute.xlu0 %751  ;;  %v1734_v15 = vmov 0.00078125  }
 0x144   :  { %v1542_v12 = vpop.eup %1541  ;;  %1551 = vpow2.f32 %v865_v9  ;;  %v867_v50 = vmul.f32 1.442695, %v812_v21  ;;  %v813_v26 = vsub.f32 %v2045_v25, %v752_v47  ;;  %vm277_vm1 = vcmp.eq.s32.totalorder %v2614_v3, %v2526_v52  ;;  %v1699_v52 = vld [vmem:[%s3096_s0] sm:$0xff] }
 0x145   :  { %919 = vadd.xlane.f32.xlu0 %v1542_v12  ;;  %v757_v57 = vpop.permute.xlu1 %756  ;;  %vm278_vm2 = vcmp.eq.s32.totalorder %v2614_v3, %v2530_v44  ;;  %v309_v39 = vsel %vm277_vm1, 0.9007813, %v1734_v15  ;;  %vm279_vm3 = vcmp.eq.s32.totalorder %v2614_v3, %v2498_v45  ;;  %vm280_vm4 = vcmp.eq.s32.totalorder %v2614_v3, %v2511_v61  ;;  %v1700_v12 = vld [vmem:[%s3096_s0 + $0x8] sm:$0xff]  ;;  %v1701_v61 = vld [vmem:[%s3096_s0 + $0x10] sm:$0xff] }
 0x146   :  { %v1544_v5 = vpop.eup %1543  ;;  %1553 = vpow2.f32 %v867_v50  ;;  %v869_v18 = vmul.f32 1.442695, %v813_v26  ;;  %v814_v23 = vsub.f32 %v2074_v30, %v757_v57  ;;  %v310_v21 = vsel %vm278_vm2, 0.9007813, %v1734_v15 }
 0x147   :  { %921 = vadd.xlane.f32.xlu1 %v1544_v5  ;;  %v762_v1 = vpop.permute.xlu0 %761  ;;  %v1046_v44 = vmul.f32 %v1699_v52, %v309_v39  ;;  %v311_v47 = vsel %vm279_vm3, 0.9007813, %v1734_v15  ;;  %v1047_v45 = vmul.f32 %v1700_v12, %v310_v21  ;;  %vm281_vm5 = vcmp.eq.s32.totalorder %v2614_v3, %v2534_v42  ;;  %v1702_v5 = vld [vmem:[%s3096_s0 + $0x18] sm:$0xff]  ;;  %v1717_v39 = vld [vmem:[%s3096_s0 + $0x90] sm:$0xff] }
 0x148   :  { %v1546_v16 = vpop.eup %1545  ;;  %1555 = vpow2.f32 %v869_v18  ;;  %v871_v11 = vmul.f32 1.442695, %v814_v23  ;;  %v815_v28 = vsub.f32 %v2057_v27, %v762_v1  ;;  %v312_v50 = vsel %vm280_vm4, 0.9007813, %v1734_v15  ;;  %v1718_v52 = vld [vmem:[%s3096_s0 + $0x98] sm:$0xff] }
 0x149   :  { %923 = vadd.xlane.f32.xlu0 %v1546_v16  ;;  %v767_v14 = vpop.permute.xlu1 %766  ;;  %v1048_v26 = vmul.f32 %v1701_v61, %v311_v47  ;;  %vm282_vm6 = vcmp.eq.s32.totalorder %v2614_v3, %v2522_v37  ;;  %v313_v57 = vsel %vm281_vm5, 0.9007813, %v1734_v15  ;;  %v1049_v18 = vmul.f32 %v1702_v5, %v312_v50  ;;  %v1703_v37 = vld [vmem:[%s3096_s0 + $0x20] sm:$0xff]  ;;  %v1704_v16 = vld [vmem:[%s3096_s0 + $0x28] sm:$0xff]  ;;  %v3244_v47 = vld [vmem:[#allocation76_spill] sm:$0xff] }
 0x14a   :  { %v1548_v58 = vpop.eup %1547  ;;  %1557 = vpow2.f32 %v871_v11  ;;  %v873_v36 = vmul.f32 1.442695, %v815_v28  ;;  %v816_v25 = vsub.f32 %v2086_v32, %v767_v14  ;;  %vm283_vm7 = vcmp.eq.s32.totalorder %v2614_v3, %v2538_v43  ;;  %v1719_v50 = vld [vmem:[%s3096_s0 + $0xa0] sm:$0xff] }
 0x14b   :  { %925 = vadd.xlane.f32.xlu1 %v1548_v58  ;;  %v772_v4 = vpop.permute.xlu0 %771  ;;  %v314_v42 = vsel %vm282_vm6, 0.9007813, %v1734_v15  ;;  %vm284_vm8 = vcmp.eq.s32.totalorder %v2614_v3, %v2524_v59  ;;  %v1050_v23 = vmul.f32 %v1703_v37, %v313_v57  ;;  %v315_v1 = vsel %vm283_vm7, 0.9007813, %v1734_v15  ;;  %v1705_v59 = vld [vmem:[%s3096_s0 + $0x30] sm:$0xff]  ;;  %v1706_v58 = vld [vmem:[%s3096_s0 + $0x38] sm:$0xff] }
 0x14c   :  { %v1550_v20 = vpop.eup %1549  ;;  %1559 = vpow2.f32 %v873_v36  ;;  %v875_v8 = vmul.f32 1.442695, %v816_v25  ;;  %v817_v30 = vsub.f32 %v2069_v29, %v772_v4  ;;  %v1051_v11 = vmul.f32 %v1704_v16, %v314_v42  ;;  %v1720_v57 = vld [vmem:[%s3096_s0 + $0xa8] sm:$0xff]  ;;  %v3247_v37 = vld [vmem:[#allocation72_spill] sm:$0xff] }
 0x14d   :  { %927 = vadd.xlane.f32.xlu0 %v1550_v20  ;;  %v777_v40 = vpop.permute.xlu1 %776  ;;  %vm285_vm9 = vcmp.eq.s32.totalorder %v2614_v3, %v2542_v60  ;;  %v316_v43 = vsel %vm284_vm8, 0.9007813, %v1734_v15  ;;  %vm286_vm10 = vcmp.eq.s32.totalorder %v2614_v3, %v2528_v53  ;;  %v1052_v28 = vmul.f32 %v1705_v59, %v315_v1  ;;  %v1707_v53 = vld [vmem:[%s3096_s0 + $0x40] sm:$0xff]  ;;  %v1708_v20 = vld [vmem:[%s3096_s0 + $0x48] sm:$0xff]  ;;  %v3248_v59 = vld [vmem:[#allocation79_spill] sm:$0xff] }
 0x14e   :  { %v1552_v56 = vpop.eup %1551  ;;  %1561 = vpow2.f32 %v875_v8  ;;  %v877_v17 = vmul.f32 1.442695, %v817_v30  ;;  %v818_v27 = vsub.f32 %v2093_v33, %v777_v40  ;;  %v317_v14 = vsel %vm285_vm9, 0.9007813, %v1734_v15 }
 0x14f   :  { %929 = vadd.xlane.f32.xlu1 %v1552_v56  ;;  %v782_v0 = vpop.permute.xlu0 %781  ;;  %v1053_v36 = vmul.f32 %v1706_v58, %v316_v43  ;;  %vm287_vm11 = vcmp.eq.s32.totalorder %v2614_v3, %v2546_v63  ;;  %v318_v60 = vsel %vm286_vm10, 0.9007813, %v1734_v15  ;;  %vm288_vm12 = vcmp.eq.s32.totalorder %v2614_v3, %v2532_v35  ;;  %v1709_v35 = vld [vmem:[%s3096_s0 + $0x50] sm:$0xff]  ;;  %v1710_v56 = vld [vmem:[%s3096_s0 + $0x58] sm:$0xff]  ;;  %v1723_v58 = vld [vmem:[%s3096_s0 + $0xc0] sm:$0xff] }
 0x150   :  { %v1554_v13 = vpop.eup %1553  ;;  %1563 = vpow2.f32 %v877_v17  ;;  %v879_v7 = vmul.f32 1.442695, %v818_v27  ;;  %v819_v32 = vsub.f32 %v2081_v31, %v782_v0  ;;  %v1054_v25 = vmul.f32 %v1707_v53, %v317_v14  ;;  %v3249_v14 = vld [vmem:[#allocation75_spill] sm:$0xff]  ;;  %v1724_v53 = vld [vmem:[%s3096_s0 + $0xc8] sm:$0xff] }
 0x151   :  { %931 = vadd.xlane.f32.xlu0 %v1554_v13  ;;  %v787_v22 = vpop.permute.xlu1 %786  ;;  %v319_v4 = vsel %vm287_vm11, 0.9007813, %v1734_v15  ;;  %v1055_v8 = vmul.f32 %v1708_v20, %v318_v60  ;;  %vm289_vm13 = vcmp.eq.s32.totalorder %v2614_v3, %v2550_v54  ;;  %v320_v63 = vsel %vm288_vm12, 0.9007813, %v1734_v15  ;;  %v1712_v13 = vld [vmem:[%s3096_s0 + $0x68] sm:$0xff] }
 0x152   :  { %v1556_v6 = vpop.eup %1555  ;;  %1565 = vpow2.f32 %v879_v7  ;;  %v881_v38 = vmul.f32 1.442695, %v819_v32  ;;  %v820_v29 = vsub.f32 %v2099_v34, %v787_v22  ;;  %vm290_vm14 = vcmp.eq.s32.totalorder %v2614_v3, %v2536_v46  ;;  %v1711_v46 = vld [vmem:[%s3096_s0 + $0x60] sm:$0xff] }
 0x153   :  { %933 = vadd.xlane.f32.xlu1 %v1556_v6  ;;  %v1056_v30 = vmul.f32 %v1709_v35, %v319_v4  ;;  %v321_v40 = vsel %vm289_vm13, 0.9007813, %v1734_v15  ;;  %v1057_v17 = vmul.f32 %v1710_v56, %v320_v63  ;;  %vm291_vm15 = vcmp.eq.s32.totalorder %v2614_v3, %v2554_v55  ;;  %v1714_v6 = vld [vmem:[%s3096_s0 + $0x78] sm:$0xff]  ;;  %v3250_v4 = vld [vmem:[#allocation81_spill] sm:$0xff]  ;;  %v1725_v63 = vld [vmem:[%s3096_s0 + $0xd0] sm:$0xff] }
 0x154   :  { %v1558_v10 = vpop.eup %1557  ;;  %1567 = vpow2.f32 %v881_v38  ;;  %v883_v19 = vmul.f32 1.442695, %v820_v29  ;;  %v322_v54 = vsel %vm290_vm14, 0.9007813, %v1734_v15  ;;  %vm292_vm1 = vcmp.eq.s32.totalorder %v2614_v3, %v2540_v51  ;;  %v1713_v51 = vld [vmem:[%s3096_s0 + $0x70] sm:$0xff] }
 0x155   :  { %935 = vadd.xlane.f32.xlu0 %v1558_v10  ;;  %v1058_v27 = vmul.f32 %v1711_v46, %v321_v40  ;;  %v323_v0 = vsel %vm291_vm15, 0.9007813, %v1734_v15  ;;  %v1059_v7 = vmul.f32 %v1712_v13, %v322_v54  ;;  %vm293_vm2 = vcmp.eq.s32.totalorder %v2614_v3, %v2558_v2  ;;  %v3240_v2 = vld [vmem:[#allocation73_spill] sm:$0xff]  ;;  %v1726_v40 = vld [vmem:[%s3096_s0 + $0xd8] sm:$0xff]  ;;  %v1728_v13 = vld [vmem:[%s3096_s0 + $0xe8] sm:$0xff] }
 0x156   :  { %v1560_v33 = vpop.eup %1559  ;;  %1569 = vpow2.f32 %v883_v19  ;;  %v324_v55 = vsel %vm292_vm1, 0.9007813, %v1734_v15  ;;  %vm294_vm3 = vcmp.eq.s32.totalorder %v2614_v3, %v2544_v62  ;;  %v1060_v32 = vmul.f32 %v1713_v51, %v323_v0  ;;  %v3241_v62 = vld [vmem:[#allocation69_spill] sm:$0xff]  ;;  %v3252_v54 = vld [vmem:[#allocation80_spill] sm:$0xff] }
 0x157   :  { %937 = vadd.xlane.f32.xlu1 %v1560_v33  ;;  %v325_v22 = vsel %vm293_vm2, 0.9007813, %v1734_v15  ;;  %v1061_v38 = vmul.f32 %v1714_v6, %v324_v55  ;;  %vm295_vm4 = vcmp.eq.s32.totalorder %v2614_v3, %v3240_v2  ;;  %v326_v29 = vsel %vm294_vm3, 0.9007813, %v1734_v15  ;;  %v1715_v10 = vld [vmem:[%s3096_s0 + $0x80] sm:$0xff]  ;;  %v1716_v33 = vld [vmem:[%s3096_s0 + $0x88] sm:$0xff] }
 0x158   :  { %v1562_v48 = vpop.eup %1561  ;;  %vm296_vm5 = vcmp.eq.s32.totalorder %v2614_v3, %v3241_v62  ;;  %v1062_v19 = vmul.f32 %v1715_v10, %v325_v22  ;;  %v327_v41 = vsel %vm295_vm4, 0.9007813, %v1734_v15  ;;  %vm299_vm8 = vcmp.eq.s32.totalorder %v2614_v3, %v3244_v47  ;;  %v1727_v46 = vld [vmem:[%s3096_s0 + $0xe0] sm:$0xff]  ;;  %v3254_v55 = vld [vmem:[#allocation8_spill] sm:$0xff]  ;;  %v1729_v22 = vld [vmem:[%s3096_s0 + $0xf0] sm:$0xff] }
 0x159   :  { %939 = vadd.xlane.f32.xlu0 %v1562_v48  ;;  %v1063_v48 = vmul.f32 %v1716_v33, %v326_v29  ;;  %vm302_vm11 = vcmp.eq.s32.totalorder %v2614_v3, %v3247_v37  ;;  %vm303_vm12 = vcmp.eq.s32.totalorder %v2614_v3, %v3248_v59  ;;  %vm304_vm13 = vcmp.eq.s32.totalorder %v2614_v3, %v3249_v14  ;;  %v3256_v29 = vld [vmem:[#allocation10_spill] sm:$0xff]  ;;  %v3257_v62 = vld [vmem:[#allocation12_spill] sm:$0xff]  ;;  %v3277_v59 = vld [vmem:[#allocation17_spill] sm:$0xff] }
 0x15a   :  { %v1564_v31 = vpop.eup %1563  ;;  %v335_v60 = vsel %vm303_vm12, 0.9007813, %v1734_v15  ;;  %vm305_vm14 = vcmp.eq.s32.totalorder %v2614_v3, %v3250_v4  ;;  %v336_v20 = vsel %vm304_vm13, 0.9007813, %v1734_v15  ;;  %vm307_vm1 = vcmp.eq.s32.totalorder %v2614_v3, %v2581_v49  ;;  %v3253_v49 = vld [vmem:[#allocation6_spill] sm:$0xff] }
 0x15b   :  { %941 = vadd.xlane.f32.xlu1 %v1564_v31  ;;  %v3242_v31 = vld [vmem:[#allocation74_spill] sm:$0xff]  ;;  %v1072_v35 = vmul.f32 %v1725_v63, %v335_v60  ;;  %v1073_v56 = vmul.f32 %v1726_v40, %v336_v20  ;;  %vm308_vm2 = vcmp.eq.s32.totalorder %v2614_v3, %v3252_v54  ;;  %v339_v0 = vsel %vm307_vm1, 0.9007813, %v1734_v15  ;;  %v567_v60 = vld [vmem:[#allocation3 + $0x10] sm:$0xff]  ;;  %v3281_v20 = vld [vmem:[#allocation28_spill] sm:$0xff] }
 0x15c   :  { %v1566_v24 = vpop.eup %1565  ;;  %vm297_vm6 = vcmp.eq.s32.totalorder %v2614_v3, %v3242_v31  ;;  %v3255_v51 = vsub.f32 %v3253_v49, %v3254_v55  ;;  %v1076_v6 = vmul.f32 %v1729_v22, %v339_v0  ;;  %v3258_v10 = vsub.f32 %v3256_v29, %v3257_v62  ;;  %v3262_v31 = vld [vmem:[#allocation14_spill] sm:$0xff]  ;;  %v568_v0 = vld [vmem:[#allocation3 + $0x18] sm:$0xff]  ;;  %v3289_v62 = vld [vmem:[#allocation25_spill] sm:$0xff] }
 0x15d   :  { %943 = vadd.xlane.f32.xlu0 %v1566_v24  ;;  %v328_v24 = vsel %vm296_vm5, 0.9007813, %v1734_v15  ;;  %v329_v21 = vsel %vm297_vm6, 0.9007813, %v1734_v15  ;;  %v3268_v47 = vld [vmem:[#allocation18_spill] sm:$0xff] }
 0x15e   :  { %v1568_v34 = vpop.eup %1567  ;;  %v1066_v61 = vmul.f32 %v1719_v50, %v329_v21  ;;  %v3266_v21 = vld [vmem:[#allocation11_spill] sm:$0xff]  ;;  %v3274_v37 = vld [vmem:[#allocation22_spill] sm:$0xff] }
 0x15f   :  { %945 = vadd.xlane.f32.xlu1 %v1568_v34  ;;  %v3243_v34 = vld [vmem:[#allocation70_spill] sm:$0xff] }
 0x160   :  { %v1570_v9 = vpop.eup %1569  ;;  %vm298_vm7 = vcmp.eq.s32.totalorder %v2614_v3, %v3243_v34  ;;  %v3280_v4 = vld [vmem:[#allocation26_spill] sm:$0xff] }
 0x161   :  { %947 = vadd.xlane.f32.xlu0 %v1570_v9  ;;  %v1064_v9 = vmul.f32 %v1717_v39, %v327_v41  ;;  %v330_v12 = vsel %vm298_vm7, 0.9007813, %v1734_v15  ;;  %v3259_v41 = vld [vmem:[#allocation5_spill] sm:$0xff]  ;;  %v3286_v55 = vld [vmem:[#allocation30_spill] sm:$0xff] }
 0x162   :  { %v1067_v5 = vmul.f32 %v1720_v57, %v330_v12  ;;  %v3269_v12 = vld [vmem:[#allocation20_spill] sm:$0xff]  ;;  %v3272_v57 = vld [vmem:[#allocation15_spill] sm:$0xff] }
 0x163   :  { %1078 = vadd.xlane.f32.xlu1 %v1046_v44  ;;  %v1065_v44 = vmul.f32 %v1718_v52, %v328_v24  ;;  %v3263_v24 = vld [vmem:[#allocation16_spill] sm:$0xff] }
 0x164   :  { %v3264_v34 = vsub.f32 %v3262_v31, %v3263_v24 }
 0x165   :  { %1080 = vadd.xlane.f32.xlu0 %v1047_v45  ;;  %v3245_v45 = vld [vmem:[#allocation71_spill] sm:$0xff] }
 0x166   :  { %vm300_vm9 = vcmp.eq.s32.totalorder %v2614_v3, %v3245_v45  ;;  %v507_v39 = vmul.f32 1.442695, %v3264_v34  ;;  %v3270_v45 = vsub.f32 %v3268_v47, %v3269_v12  ;;  %v3292_v34 = vld [vmem:[#allocation34_spill] sm:$0xff] }
 0x167   :  { %1082 = vadd.xlane.f32.xlu1 %v1048_v26  ;;  %v331_v26 = vsel %vm299_vm8, 0.9007813, %v1734_v15  ;;  %v332_v42 = vsel %vm300_vm9, 0.9007813, %v1734_v15 }
 0x168   :  { %v511_v50 = vmul.f32 1.442695, %v3270_v45 }
 0x169   :  { %1084 = vadd.xlane.f32.xlu0 %v1049_v18  ;;  %v3246_v18 = vld [vmem:[#allocation78_spill] sm:$0xff] }
 0x16a   :  { %vm301_vm10 = vcmp.eq.s32.totalorder %v2614_v3, %v3246_v18 }
 0x16b   :  { %1086 = vadd.xlane.f32.xlu1 %v1050_v23  ;;  %v1721_v23 = vld [vmem:[%s3096_s0 + $0xb0] sm:$0xff]  ;;  %v333_v16 = vsel %vm301_vm10, 0.9007813, %v1734_v15 }
 0x16c   :  { %v1068_v1 = vmul.f32 %v1721_v23, %v331_v26  ;;  %v3271_v26 = vld [vmem:[#allocation13_spill] sm:$0xff]  ;;  %v3275_v23 = vld [vmem:[#allocation24_spill] sm:$0xff] }
 0x16d   :  { %1088 = vadd.xlane.f32.xlu0 %v1051_v11  ;;  %v1722_v11 = vld [vmem:[%s3096_s0 + $0xb8] sm:$0xff] }
 0x16e   :  { %v1069_v43 = vmul.f32 %v1722_v11, %v332_v42  ;;  %v565_v42 = vld [vmem:[#allocation3] sm:$0xff] }
 0x16f   :  { %1090 = vadd.xlane.f32.xlu1 %v1052_v28  ;;  %v334_v28 = vsel %vm302_vm11, 0.9007813, %v1734_v15 }
 0x171   :  { %1092 = vadd.xlane.f32.xlu0 %v1053_v36  ;;  %v1070_v36 = vmul.f32 %v1723_v58, %v333_v16 }
 0x173   :  { %1094 = vadd.xlane.f32.xlu1 %v1054_v25  ;;  %v1071_v25 = vmul.f32 %v1724_v53, %v334_v28  ;;  %v3278_v28 = vld [vmem:[#allocation19_spill] sm:$0xff] }
 0x174   :  { %v3279_v14 = vsub.f32 %v3277_v59, %v3278_v28  ;;  %v573_v28 = vld [vmem:[#allocation3 + $0x40] sm:$0xff] }
 0x175   :  { %1096 = vadd.xlane.f32.xlu0 %v1055_v8  ;;  %v3251_v8 = vld [vmem:[#allocation77_spill] sm:$0xff] }
 0x176   :  { %vm306_vm15 = vcmp.eq.s32.totalorder %v2614_v3, %v3251_v8  ;;  %v340_v3 = vsel %vm308_vm2, 0.9007813, %v1734_v15  ;;  %v517_v58 = vmul.f32 1.442695, %v3279_v14  ;;  %v3282_v8 = vsub.f32 %v3280_v4, %v3281_v20 }
 0x177   :  { %1098 = vadd.xlane.f32.xlu1 %v1056_v30  ;;  %v337_v30 = vsel %vm305_vm14, 0.9007813, %v1734_v15 }
 0x178   :  { %v519_v63 = vmul.f32 1.442695, %v3282_v8  ;;  %v574_v8 = vld [vmem:[#allocation3 + $0x48] sm:$0xff] }
 0x179   :  { %1100 = vadd.xlane.f32.xlu0 %v1057_v17  ;;  %v338_v17 = vsel %vm306_vm15, 0.9007813, %v1734_v15  ;;  %v3260_v15 = vld [vmem:[#allocation7_spill] sm:$0xff] }
 0x17a   :  { %v3261_v33 = vsub.f32 %v3259_v41, %v3260_v15 }
 0x17b   :  { %1102 = vadd.xlane.f32.xlu1 %v1058_v27  ;;  %v1074_v27 = vmul.f32 %v1727_v46, %v337_v30 }
 0x17d   :  { %1104 = vadd.xlane.f32.xlu0 %v1059_v7  ;;  %v1075_v7 = vmul.f32 %v1728_v13, %v338_v17  ;;  %v3284_v17 = vld [vmem:[#allocation23_spill] sm:$0xff] }
 0x17f   :  { %1106 = vadd.xlane.f32.xlu1 %v1060_v32  ;;  %v501_v32 = vmul.f32 1.442695, %v3255_v51  ;;  %v3287_v51 = vld [vmem:[#allocation32_spill] sm:$0xff] }
 0x181   :  { %1108 = vadd.xlane.f32.xlu0 %v1061_v38  ;;  %v1730_v38 = vld [vmem:[%s3096_s0 + $0xf8] sm:$0xff]  ;;  %1571 = vpow2.f32 %v501_v32  ;;  %v3288_v32 = vsub.f32 %v3286_v55, %v3287_v51  ;;  %v3308_v55 = vld [vmem:[#allocation39_spill] sm:$0xff] }
 0x182   :  { %v1077_v2 = vmul.f32 %v1730_v38, %v340_v3 }
 0x183   :  { %1110 = vadd.xlane.f32.xlu1 %v1062_v19  ;;  %v505_v19 = vmul.f32 1.442695, %v3258_v10  ;;  %v523_v3 = vmul.f32 1.442695, %v3288_v32  ;;  %v3290_v10 = vld [vmem:[#allocation27_spill] sm:$0xff] }
 0x185   :  { %1112 = vadd.xlane.f32.xlu0 %v1063_v48  ;;  %v503_v48 = vmul.f32 1.442695, %v3261_v33  ;;  %1573 = vpow2.f32 %v505_v19  ;;  %v3291_v19 = vsub.f32 %v3289_v62, %v3290_v10  ;;  %v570_v33 = vld [vmem:[#allocation3 + $0x28] sm:$0xff]  ;;  %v3311_v62 = vld [vmem:[#allocation48_spill] sm:$0xff] }
 0x187   :  { %1114 = vadd.xlane.f32.xlu1 %v1064_v9  ;;  %1575 = vpow2.f32 %v503_v48  ;;  %v3265_v9 = vld [vmem:[#allocation9_spill] sm:$0xff]  ;;  %v525_v41 = vmul.f32 1.442695, %v3291_v19 }
 0x188   :  { %v3267_v52 = vsub.f32 %v3265_v9, %v3266_v21  ;;  %1577 = vpow2.f32 %v507_v39  ;;  %v3293_v39 = vld [vmem:[#allocation36_spill] sm:$0xff] }
 0x189   :  { %1116 = vadd.xlane.f32.xlu0 %v1065_v44  ;;  %v3294_v9 = vsub.f32 %v3292_v34, %v3293_v39  ;;  %v3314_v34 = vld [vmem:[#allocation43_spill] sm:$0xff] }
 0x18a   :  { %v509_v44 = vmul.f32 1.442695, %v3267_v52 }
 0x18b   :  { %1118 = vadd.xlane.f32.xlu1 %v1066_v61  ;;  %v1572_v61 = vpop.eup %1571  ;;  %v527_v21 = vmul.f32 1.442695, %v3294_v9 }
 0x18c   :  { %1579 = vpow2.f32 %v509_v44  ;;  %v597_v11 = vmul.f32 %v1572_v61, %v565_v42  ;;  %v571_v44 = vld [vmem:[#allocation3 + $0x30] sm:$0xff] }
 0x18d   :  { %1120 = vadd.xlane.f32.xlu0 %v1067_v5  ;;  %v3273_v5 = vsub.f32 %v3271_v26, %v3272_v57  ;;  %1581 = vpow2.f32 %v511_v50  ;;  %v3295_v50 = vld [vmem:[#allocation29_spill] sm:$0xff]  ;;  %v3296_v61 = vld [vmem:[#allocation31_spill] sm:$0xff] }
 0x18e   :  { %v3297_v26 = vsub.f32 %v3295_v50, %v3296_v61  ;;  %v3317_v50 = vld [vmem:[#allocation52_spill] sm:$0xff] }
 0x18f   :  { %1122 = vadd.xlane.f32.xlu1 %v1068_v1  ;;  %v513_v18 = vmul.f32 1.442695, %v3273_v5  ;;  %v3276_v1 = vsub.f32 %v3274_v37, %v3275_v23 }
 0x190   :  { %v529_v57 = vmul.f32 1.442695, %v3297_v26 }
 0x191   :  { %1124 = vadd.xlane.f32.xlu0 %v1069_v43  ;;  %v515_v16 = vmul.f32 1.442695, %v3276_v1  ;;  %v1574_v43 = vpop.eup %1573  ;;  %1583 = vpow2.f32 %v513_v18  ;;  %v572_v18 = vld [vmem:[#allocation3 + $0x38] sm:$0xff]  ;;  %v3298_v1 = vld [vmem:[#allocation38_spill] sm:$0xff] }
 0x192   :  { %v599_v30 = vmul.f32 %v1574_v43, %v567_v60  ;;  %v3301_v60 = vld [vmem:[#allocation33_spill] sm:$0xff] }
 0x193   :  { %1126 = vadd.xlane.f32.xlu1 %v1070_v36  ;;  %1585 = vpow2.f32 %v515_v16  ;;  %v3299_v16 = vld [vmem:[#allocation40_spill] sm:$0xff] }
 0x194   :  { %1587 = vpow2.f32 %v517_v58 }
 0x195   :  { %1128 = vadd.xlane.f32.xlu0 %v1071_v25  ;;  %v1576_v25 = vpop.eup %1575  ;;  %1589 = vpow2.f32 %v519_v63 }
 0x196   :  { %v1578_v40 = vpop.eup %1577 }
 0x197   :  { %1130 = vadd.xlane.f32.xlu1 %v1072_v35  ;;  %v566_v35 = vld [vmem:[#allocation3 + $0x8] sm:$0xff]  ;;  %v1580_v49 = vpop.eup %1579 }
 0x198   :  { %v1582_v29 = vpop.eup %1581 }
 0x199   :  { %1132 = vadd.xlane.f32.xlu0 %v1073_v56  ;;  %v3283_v56 = vld [vmem:[#allocation21_spill] sm:$0xff]  ;;  %v602_v12 = vmul.f32 %v1582_v29, %v570_v33  ;;  %v3310_v29 = vld [vmem:[#allocation46_spill] sm:$0xff] }
 0x19a   :  { %v3285_v54 = vsub.f32 %v3283_v56, %v3284_v17  ;;  %v3305_v56 = vld [vmem:[#allocation44_spill] sm:$0xff]  ;;  %v3312_v10 = vsub.f32 %v3310_v29, %v3311_v62  ;;  %v3332_v29 = vld [vmem:[#allocation55_spill] sm:$0xff] }
 0x19b   :  { %1134 = vadd.xlane.f32.xlu1 %v1074_v27  ;;  %v1584_v24 = vpop.eup %1583 }
 0x19c   :  { %v521_v46 = vmul.f32 1.442695, %v3285_v54  ;;  %v603_v37 = vmul.f32 %v1584_v24, %v571_v44  ;;  %v539_v19 = vmul.f32 1.442695, %v3312_v10  ;;  %v3313_v24 = vld [vmem:[#allocation41_spill] sm:$0xff] }
 0x19d   :  { %1136 = vadd.xlane.f32.xlu0 %v1075_v7  ;;  %v598_v7 = vmul.f32 %v1576_v25, %v566_v35  ;;  %v1586_v45 = vpop.eup %1585  ;;  %v3315_v39 = vsub.f32 %v3313_v24, %v3314_v34  ;;  %v3335_v24 = vld [vmem:[#allocation64_spill] sm:$0xff] }
 0x19e   :  { %1591 = vpow2.f32 %v521_v46  ;;  %v1588_v23 = vpop.eup %1587  ;;  %v604_v58 = vmul.f32 %v1586_v45, %v572_v18  ;;  %v3316_v45 = vld [vmem:[#allocation50_spill] sm:$0xff] }
 0x19f   :  { %1138 = vadd.xlane.f32.xlu1 %v1076_v6  ;;  %v569_v6 = vld [vmem:[#allocation3 + $0x20] sm:$0xff]  ;;  %1593 = vpow2.f32 %v523_v3  ;;  %v605_v35 = vmul.f32 %v1588_v23, %v573_v28  ;;  %v541_v9 = vmul.f32 1.442695, %v3315_v39  ;;  %v3318_v61 = vsub.f32 %v3316_v45, %v3317_v50  ;;  %v3338_v45 = vld [vmem:[#allocation59_spill] sm:$0xff] }
 0x1a0   :  { %v601_v31 = vmul.f32 %v1580_v49, %v569_v6  ;;  %1595 = vpow2.f32 %v525_v41  ;;  %v3307_v49 = vld [vmem:[#allocation37_spill] sm:$0xff] }
 0x1a1   :  { %1140 = vadd.xlane.f32.xlu0 %v1077_v2  ;;  %v600_v2 = vmul.f32 %v1578_v40, %v568_v0  ;;  %1597 = vpow2.f32 %v527_v21  ;;  %v3304_v40 = vld [vmem:[#allocation42_spill] sm:$0xff]  ;;  %v3309_v51 = vsub.f32 %v3307_v49, %v3308_v55  ;;  %v543_v26 = vmul.f32 1.442695, %v3318_v61  ;;  %v3319_v23 = vld [vmem:[#allocation45_spill] sm:$0xff]  ;;  %v3329_v49 = vld [vmem:[#allocation60_spill] sm:$0xff] }
 0x1a2   :  { %1599 = vpow2.f32 %v529_v57  ;;  %v3306_v17 = vsub.f32 %v3304_v40, %v3305_v56  ;;  %v3326_v40 = vld [vmem:[#allocation51_spill] sm:$0xff] }
 0x1a3   :  { %v537_v32 = vmul.f32 1.442695, %v3309_v51 }
 0x1a4   :  { %v535_v54 = vmul.f32 1.442695, %v3306_v17 }
 0x1ae   :  { %v886_v36 = vpop.xlane.xlu0 %885 }
 0x1af   :  { %v949_v53 = vadd.f32 %v886_v36, %v597_v11  ;;  %v3300_v11 = vsub.f32 %v3298_v1, %v3299_v16  ;;  %v1590_v36 = vpop.eup %1589  ;;  %v3320_v1 = vld [vmem:[#allocation47_spill] sm:$0xff] }
 0x1b0   :  { %v3321_v16 = vsub.f32 %v3319_v23, %v3320_v1  ;;  %v3341_v23 = vld [vmem:[#allocation66_spill] sm:$0xff] }
 0x1b1   :  { %982 = vst.msk [vmem:[#allocation3] sm:$0xff] %vm15_vm0, %v949_v53  ;;  %v531_v43 = vmul.f32 1.442695, %v3300_v11  ;;  %v3302_v53 = vld [vmem:[#allocation35_spill] sm:$0xff] }
 0x1b2   :  { %v890_v27 = vpop.xlane.xlu0 %889  ;;  %v3303_v25 = vsub.f32 %v3301_v60, %v3302_v53  ;;  %v545_v11 = vmul.f32 1.442695, %v3321_v16  ;;  %v3323_v60 = vld [vmem:[#allocation56_spill] sm:$0xff] }
 0x1b3   :  { %v951_v13 = vadd.f32 %v890_v27, %v599_v30  ;;  %v1592_v30 = vpop.eup %1591  ;;  %1601 = vpow2.f32 %v531_v43  ;;  %v575_v27 = vld [vmem:[#allocation3 + $0x50] sm:$0xff] }
 0x1b4   :  { %v888_v22 = vpop.xlane.xlu1 %887  ;;  %v533_v4 = vmul.f32 1.442695, %v3303_v25 }
 0x1b5   :  { %984 = vst.msk [vmem:[#allocation3 + $0x10] sm:$0xff] %vm15_vm0, %v951_v13  ;;  %v950_v38 = vadd.f32 %v888_v22, %v598_v7  ;;  %v606_v13 = vmul.f32 %v1590_v36, %v574_v8  ;;  %v1594_v7 = vpop.eup %1593  ;;  %v576_v22 = vld [vmem:[#allocation3 + $0x58] sm:$0xff]  ;;  %v3322_v36 = vld [vmem:[#allocation54_spill] sm:$0xff] }
 0x1b6   :  { %v892_v15 = vpop.xlane.xlu0 %891  ;;  %1603 = vpow2.f32 %v533_v4  ;;  %v3324_v53 = vsub.f32 %v3322_v36, %v3323_v60  ;;  %v3344_v36 = vld [vmem:[#allocation63_spill] sm:$0xff] }
 0x1b7   :  { %983 = vst.msk [vmem:[#allocation3 + $0x8] sm:$0xff] %vm15_vm0, %v950_v38  ;;  %v952_v48 = vadd.f32 %v892_v15, %v600_v2  ;;  %v607_v38 = vmul.f32 %v1592_v30, %v575_v27  ;;  %v1596_v2 = vpop.eup %1595  ;;  %1605 = vpow2.f32 %v535_v54  ;;  %v577_v15 = vld [vmem:[#allocation3 + $0x60] sm:$0xff] }
 0x1b8   :  { %v894_v52 = vpop.xlane.xlu1 %893  ;;  %1607 = vpow2.f32 %v537_v32  ;;  %v547_v25 = vmul.f32 1.442695, %v3324_v53  ;;  %v3325_v30 = vld [vmem:[#allocation49_spill] sm:$0xff] }
 0x1b9   :  { %985 = vst.msk [vmem:[#allocation3 + $0x18] sm:$0xff] %vm15_vm0, %v952_v48  ;;  %v953_v47 = vadd.f32 %v894_v52, %v601_v31  ;;  %v608_v48 = vmul.f32 %v1594_v7, %v576_v22  ;;  %v1598_v31 = vpop.eup %1597  ;;  %v578_v52 = vld [vmem:[#allocation3 + $0x68] sm:$0xff]  ;;  %1609 = vpow2.f32 %v539_v19  ;;  %v3327_v56 = vsub.f32 %v3325_v30, %v3326_v40  ;;  %v3347_v30 = vld [vmem:[#allocation68_spill] sm:$0xff] }
 0x1ba   :  { %v896_v5 = vpop.xlane.xlu0 %895  ;;  %1611 = vpow2.f32 %v541_v9  ;;  %v3328_v7 = vld [vmem:[#allocation58_spill] sm:$0xff] }
 0x1bb   :  { %986 = vst.msk [vmem:[#allocation3 + $0x20] sm:$0xff] %vm15_vm0, %v953_v47  ;;  %v954_v42 = vadd.f32 %v896_v5, %v602_v12  ;;  %v609_v47 = vmul.f32 %v1596_v2, %v577_v15  ;;  %v1600_v12 = vpop.eup %1599  ;;  %v579_v5 = vld [vmem:[#allocation3 + $0x70] sm:$0xff]  ;;  %1613 = vpow2.f32 %v543_v26  ;;  %v549_v17 = vmul.f32 1.442695, %v3327_v56  ;;  %v3331_v2 = vld [vmem:[#allocation53_spill] sm:$0xff] }
 0x1bc   :  { %v898_v59 = vpop.xlane.xlu1 %897  ;;  %1615 = vpow2.f32 %v545_v11  ;;  %v3330_v55 = vsub.f32 %v3328_v7, %v3329_v49  ;;  %v3333_v62 = vsub.f32 %v3331_v2, %v3332_v29  ;;  %v590_v7 = vld [vmem:[#allocation3 + $0xc8] sm:$0xff]  ;;  %v592_v29 = vld [vmem:[#allocation3 + $0xd8] sm:$0xff] }
 0x1bd   :  { %987 = vst.msk [vmem:[#allocation3 + $0x28] sm:$0xff] %vm15_vm0, %v954_v42  ;;  %v955_v14 = vadd.f32 %v898_v59, %v603_v37  ;;  %v610_v42 = vmul.f32 %v1598_v31, %v578_v52  ;;  %v1602_v37 = vpop.eup %1601  ;;  %v580_v59 = vld [vmem:[#allocation3 + $0x78] sm:$0xff]  ;;  %1617 = vpow2.f32 %v547_v25  ;;  %v3334_v31 = vld [vmem:[#allocation62_spill] sm:$0xff] }
 0x1be   :  { %v900_v20 = vpop.xlane.xlu0 %899  ;;  %v551_v51 = vmul.f32 1.442695, %v3330_v55  ;;  %1619 = vpow2.f32 %v549_v17  ;;  %v553_v10 = vmul.f32 1.442695, %v3333_v62  ;;  %v3336_v34 = vsub.f32 %v3334_v31, %v3335_v24 }
 0x1bf   :  { %988 = vst.msk [vmem:[#allocation3 + $0x30] sm:$0xff] %vm15_vm0, %v955_v14  ;;  %v956_v63 = vadd.f32 %v900_v20, %v604_v58  ;;  %v611_v14 = vmul.f32 %v1600_v12, %v579_v5  ;;  %v581_v20 = vld [vmem:[#allocation3 + $0x80] sm:$0xff] }
 0x1c0   :  { %v902_v46 = vpop.xlane.xlu1 %901  ;;  %v1604_v58 = vpop.eup %1603  ;;  %1621 = vpow2.f32 %v551_v51  ;;  %v555_v39 = vmul.f32 1.442695, %v3336_v34  ;;  %v3337_v12 = vld [vmem:[#allocation57_spill] sm:$0xff] }
 0x1c1   :  { %989 = vst.msk [vmem:[#allocation3 + $0x38] sm:$0xff] %vm15_vm0, %v956_v63  ;;  %v957_v0 = vadd.f32 %v902_v46, %v605_v35  ;;  %v612_v63 = vmul.f32 %v1602_v37, %v580_v59  ;;  %v1606_v35 = vpop.eup %1605  ;;  %v582_v46 = vld [vmem:[#allocation3 + $0x88] sm:$0xff]  ;;  %1623 = vpow2.f32 %v553_v10  ;;  %v3339_v50 = vsub.f32 %v3337_v12, %v3338_v45  ;;  %v3340_v37 = vld [vmem:[#allocation65_spill] sm:$0xff]  ;;  %v595_v12 = vld [vmem:[#allocation3 + $0xf0] sm:$0xff] }
 0x1c2   :  { %v904_v3 = vpop.xlane.xlu0 %903  ;;  %1625 = vpow2.f32 %v555_v39  ;;  %v3342_v1 = vsub.f32 %v3340_v37, %v3341_v23  ;;  %v594_v39 = vld [vmem:[#allocation3 + $0xe8] sm:$0xff]  ;;  %v1275_v45 = vld [vmem:[#allocation3 + $0x10] sm:$0xff] }
 0x1c3   :  { %990 = vst.msk [vmem:[#allocation3 + $0x40] sm:$0xff] %vm15_vm0, %v957_v0  ;;  %v958_v6 = vadd.f32 %v904_v3, %v606_v13  ;;  %v613_v0 = vmul.f32 %v1604_v58, %v581_v20  ;;  %v1608_v13 = vpop.eup %1607  ;;  %v583_v3 = vld [vmem:[#allocation3 + $0x90] sm:$0xff]  ;;  %v557_v61 = vmul.f32 1.442695, %v3339_v50  ;;  %v3343_v58 = vld [vmem:[#allocation61_spill] sm:$0xff] }
 0x1c4   :  { %v906_v41 = vpop.xlane.xlu1 %905  ;;  %v559_v16 = vmul.f32 1.442695, %v3342_v1  ;;  %v3345_v60 = vsub.f32 %v3343_v58, %v3344_v36  ;;  %v1277_v1 = vld [vmem:[#allocation3 + $0x20] sm:$0xff]  ;;  %v1015_v36 = vld [vmem:[#allocation4 + $0x8] sm:$0xff] }
 0x1c5   :  { %991 = vst.msk [vmem:[#allocation3 + $0x48] sm:$0xff] %vm15_vm0, %v958_v6  ;;  %v959_v33 = vadd.f32 %v906_v41, %v607_v38  ;;  %v614_v6 = vmul.f32 %v1606_v35, %v582_v46  ;;  %v1610_v38 = vpop.eup %1609  ;;  %v584_v41 = vld [vmem:[#allocation3 + $0x98] sm:$0xff]  ;;  %1627 = vpow2.f32 %v557_v61  ;;  %v3346_v35 = vld [vmem:[#allocation67_spill] sm:$0xff] }
 0x1c6   :  { %v908_v21 = vpop.xlane.xlu0 %907  ;;  %v561_v53 = vmul.f32 1.442695, %v3345_v60  ;;  %1629 = vpow2.f32 %v559_v16  ;;  %v3348_v40 = vsub.f32 %v3346_v35, %v3347_v30  ;;  %v1279_v60 = vld [vmem:[#allocation3 + $0x30] sm:$0xff] }
 0x1c7   :  { %992 = vst.msk [vmem:[#allocation3 + $0x50] sm:$0xff] %vm15_vm0, %v959_v33  ;;  %v960_v44 = vadd.f32 %v908_v21, %v608_v48  ;;  %v615_v33 = vmul.f32 %v1608_v13, %v583_v3  ;;  %v1612_v48 = vpop.eup %1611  ;;  %v585_v21 = vld [vmem:[#allocation3 + $0xa0] sm:$0xff]  ;;  %v591_v3 = vld [vmem:[#allocation3 + $0xd0] sm:$0xff] }
 0x1c8   :  { %v910_v57 = vpop.xlane.xlu1 %909  ;;  %v563_v56 = vmul.f32 1.442695, %v3348_v40  ;;  %1631 = vpow2.f32 %v561_v53  ;;  %v1017_v40 = vld [vmem:[#allocation4 + $0x18] sm:$0xff] }
 0x1c9   :  { %993 = vst.msk [vmem:[#allocation3 + $0x58] sm:$0xff] %vm15_vm0, %v960_v44  ;;  %v961_v18 = vadd.f32 %v910_v57, %v609_v47  ;;  %v616_v44 = vmul.f32 %v1610_v38, %v584_v41  ;;  %v1614_v47 = vpop.eup %1613  ;;  %v586_v57 = vld [vmem:[#allocation3 + $0xa8] sm:$0xff] }
 0x1ca   :  { %v912_v43 = vpop.xlane.xlu0 %911  ;;  %1633 = vpow2.f32 %v563_v56  ;;  %v1281_v56 = vld [vmem:[#allocation3 + $0x40] sm:$0xff] }
 0x1cb   :  { %994 = vst.msk [vmem:[#allocation3 + $0x60] sm:$0xff] %vm15_vm0, %v961_v18  ;;  %v962_v28 = vadd.f32 %v912_v43, %v610_v42  ;;  %v617_v18 = vmul.f32 %v1612_v48, %v585_v21  ;;  %v1616_v42 = vpop.eup %1615  ;;  %v587_v43 = vld [vmem:[#allocation3 + $0xb0] sm:$0xff] }
 0x1cc   :  { %v914_v4 = vpop.xlane.xlu1 %913 }
 0x1cd   :  { %995 = vst.msk [vmem:[#allocation3 + $0x68] sm:$0xff] %vm15_vm0, %v962_v28  ;;  %v963_v8 = vadd.f32 %v914_v4, %v611_v14  ;;  %v618_v28 = vmul.f32 %v1614_v47, %v586_v57  ;;  %v1618_v14 = vpop.eup %1617  ;;  %v588_v4 = vld [vmem:[#allocation3 + $0xb8] sm:$0xff] }
 0x1ce   :  { %v916_v54 = vpop.xlane.xlu0 %915 }
 0x1cf   :  { %996 = vst.msk [vmem:[#allocation3 + $0x70] sm:$0xff] %vm15_vm0, %v963_v8  ;;  %v964_v27 = vadd.f32 %v916_v54, %v612_v63  ;;  %v619_v8 = vmul.f32 %v1616_v42, %v587_v43  ;;  %v1620_v63 = vpop.eup %1619  ;;  %v589_v54 = vld [vmem:[#allocation3 + $0xc0] sm:$0xff] }
 0x1d0   :  { %v918_v32 = vpop.xlane.xlu1 %917  ;;  %v621_v55 = vmul.f32 %v1620_v63, %v589_v54 }
 0x1d1   :  { %997 = vst.msk [vmem:[#allocation3 + $0x78] sm:$0xff] %vm15_vm0, %v964_v27  ;;  %v965_v22 = vadd.f32 %v918_v32, %v613_v0  ;;  %v620_v27 = vmul.f32 %v1618_v14, %v588_v4  ;;  %v1622_v0 = vpop.eup %1621 }
 0x1d2   :  { %v920_v19 = vpop.xlane.xlu0 %919  ;;  %v1624_v51 = vpop.eup %1623 }
 0x1d3   :  { %998 = vst.msk [vmem:[#allocation3 + $0x80] sm:$0xff] %vm15_vm0, %v965_v22  ;;  %v966_v15 = vadd.f32 %v920_v19, %v614_v6  ;;  %v622_v6 = vmul.f32 %v1622_v0, %v590_v7  ;;  %v1626_v38 = vpop.eup %1625  ;;  %v623_v10 = vmul.f32 %v1624_v51, %v591_v3  ;;  %v1018_v0 = vld [vmem:[#allocation4 + $0x20] sm:$0xff]  ;;  %v1019_v3 = vld [vmem:[#allocation4 + $0x28] sm:$0xff] }
 0x1d4   :  { %v922_v9 = vpop.xlane.xlu1 %921  ;;  %v1628_v19 = vpop.eup %1627  ;;  %v624_v31 = vmul.f32 %v1626_v38, %v592_v29  ;;  %v1241_v51 = vld [vmem:[#allocation2] sm:$0xff] }
 0x1d5   :  { %999 = vst.msk [vmem:[#allocation3 + $0x88] sm:$0xff] %vm15_vm0, %v966_v15  ;;  %v967_v52 = vadd.f32 %v922_v9, %v615_v33  ;;  %v593_v15 = vld [vmem:[#allocation3 + $0xe0] sm:$0xff]  ;;  %v1630_v24 = vpop.eup %1629  ;;  %v1274_v9 = vld [vmem:[#allocation3 + $0x8] sm:$0xff] }
 0x1d6   :  { %v924_v26 = vpop.xlane.xlu0 %923  ;;  %v1273_v33 = vld [vmem:[#allocation3] sm:$0xff]  ;;  %v626_v61 = vmul.f32 %v1630_v24, %v594_v39  ;;  %v1243_v39 = vld [vmem:[#allocation2 + $0x10] sm:$0xff] }
 0x1d7   :  { %1000 = vst.msk [vmem:[#allocation3 + $0x90] sm:$0xff] %vm15_vm0, %v967_v52  ;;  %v968_v5 = vadd.f32 %v924_v26, %v616_v44  ;;  %v625_v52 = vmul.f32 %v1628_v19, %v593_v15  ;;  %v1632_v44 = vpop.eup %1631  ;;  %1635 = vlog2.f32 %v1273_v33  ;;  %v1284_v15 = vld [vmem:[#allocation3 + $0x58] sm:$0xff] }
 0x1d8   :  { %v926_v11 = vpop.xlane.xlu1 %925  ;;  %v1634_v26 = vpop.eup %1633  ;;  %1637 = vlog2.f32 %v1274_v9  ;;  %v627_v37 = vmul.f32 %v1632_v44, %v595_v12  ;;  %v1285_v44 = vld [vmem:[#allocation3 + $0x60] sm:$0xff] }
 0x1d9   :  { %1001 = vst.msk [vmem:[#allocation3 + $0x98] sm:$0xff] %vm15_vm0, %v968_v5  ;;  %v969_v59 = vadd.f32 %v926_v11, %v617_v18  ;;  %v596_v5 = vld [vmem:[#allocation3 + $0xf8] sm:$0xff]  ;;  %1639 = vlog2.f32 %v1275_v45 }
 0x1da   :  { %v928_v25 = vpop.xlane.xlu0 %927  ;;  %v1276_v18 = vld [vmem:[#allocation3 + $0x18] sm:$0xff]  ;;  %v628_v11 = vmul.f32 %v1634_v26, %v596_v5 }
 0x1db   :  { %1002 = vst.msk [vmem:[#allocation3 + $0xa0] sm:$0xff] %vm15_vm0, %v969_v59  ;;  %v970_v20 = vadd.f32 %v928_v25, %v618_v28  ;;  %1641 = vlog2.f32 %v1276_v18  ;;  %v1014_v59 = vld [vmem:[#allocation4] sm:$0xff]  ;;  %v1278_v28 = vld [vmem:[#allocation3 + $0x28] sm:$0xff]  ;;  %v1244_v26 = vld [vmem:[#allocation2 + $0x18] sm:$0xff] }
 0x1dc   :  { %v930_v17 = vpop.xlane.xlu1 %929  ;;  %1643 = vlog2.f32 %v1277_v1  ;;  %v1022_v18 = vld [vmem:[#allocation4 + $0x40] sm:$0xff] }
 0x1dd   :  { %1003 = vst.msk [vmem:[#allocation3 + $0xa8] sm:$0xff] %vm15_vm0, %v970_v20  ;;  %v971_v46 = vadd.f32 %v930_v17, %v619_v8  ;;  %1645 = vlog2.f32 %v1278_v28  ;;  %v1016_v20 = vld [vmem:[#allocation4 + $0x10] sm:$0xff]  ;;  %v1280_v8 = vld [vmem:[#allocation3 + $0x38] sm:$0xff] }
 0x1de   :  { %v932_v13 = vpop.xlane.xlu0 %931  ;;  %1647 = vlog2.f32 %v1279_v60 }
 0x1df   :  { %1004 = vst.msk [vmem:[#allocation3 + $0xb0] sm:$0xff] %vm15_vm0, %v971_v46  ;;  %v972_v49 = vadd.f32 %v932_v13, %v620_v27  ;;  %1649 = vlog2.f32 %v1280_v8  ;;  %v1282_v13 = vld [vmem:[#allocation3 + $0x48] sm:$0xff] }
 0x1e0   :  { %v934_v32 = vpop.xlane.xlu1 %933  ;;  %1651 = vlog2.f32 %v1281_v56 }
 0x1e1   :  { %1005 = vst.msk [vmem:[#allocation3 + $0xb8] sm:$0xff] %vm15_vm0, %v972_v49  ;;  %v973_v22 = vadd.f32 %v934_v32, %v621_v55  ;;  %v1636_v25 = vpop.eup %1635  ;;  %1653 = vlog2.f32 %v1282_v13 }
 0x1e2   :  { %v936_v2 = vpop.xlane.xlu0 %935  ;;  %v1638_v35 = vpop.eup %1637  ;;  %v1306_v17 = vmul.f32 0.6931472, %v1636_v25 }
 0x1e3   :  { %1006 = vst.msk [vmem:[#allocation3 + $0xc0] sm:$0xff] %vm15_vm0, %v973_v22  ;;  %v974_v62 = vadd.f32 %v936_v2, %v622_v6  ;;  %v1640_v46 = vpop.eup %1639  ;;  %v1308_v7 = vmul.f32 0.6931472, %v1638_v35  ;;  %v1283_v22 = vld [vmem:[#allocation3 + $0x50] sm:$0xff] }
 0x1e4   :  { %v938_v41 = vpop.xlane.xlu1 %937  ;;  %v1369_v6 = vadd.f32 %v1306_v17, %v1241_v51  ;;  %v1310_v38 = vmul.f32 0.6931472, %v1640_v46  ;;  %1655 = vlog2.f32 %v1283_v22  ;;  %v1024_v35 = vld [vmem:[#allocation4 + $0x50] sm:$0xff] }
 0x1e5   :  { %1007 = vst.msk [vmem:[#allocation3 + $0xc8] sm:$0xff] %vm15_vm0, %v974_v62  ;;  %v975_v48 = vadd.f32 %v938_v41, %v623_v10  ;;  %v1642_v55 = vpop.eup %1641  ;;  %v1242_v62 = vld [vmem:[#allocation2 + $0x8] sm:$0xff]  ;;  %v1020_v41 = vld [vmem:[#allocation4 + $0x30] sm:$0xff]  ;;  %1657 = vlog2.f32 %v1284_v15 }
 0x1e6   :  { %v940_v34 = vpop.xlane.xlu0 %939  ;;  %v1644_v29 = vpop.eup %1643  ;;  %v1371_v12 = vadd.f32 %v1310_v38, %v1243_v39  ;;  %1659 = vlog2.f32 %v1285_v44  ;;  %v1291_v39 = vld [vmem:[#allocation3 + $0x90] sm:$0xff] }
 0x1e7   :  { %1008 = vst.msk [vmem:[#allocation3 + $0xd0] sm:$0xff] %vm15_vm0, %v975_v48  ;;  %v976_v21 = vadd.f32 %v940_v34, %v624_v31  ;;  %v1370_v48 = vadd.f32 %v1308_v7, %v1242_v62  ;;  %v1312_v31 = vmul.f32 0.6931472, %v1642_v55  ;;  %v1646_v34 = vpop.eup %1645  ;;  %v1314_v45 = vmul.f32 0.6931472, %v1644_v29  ;;  %v1025_v7 = vld [vmem:[#allocation4 + $0x58] sm:$0xff] }
 0x1e8   :  { %v942_v47 = vpop.xlane.xlu1 %941  ;;  %v1316_v1 = vmul.f32 0.6931472, %v1646_v34  ;;  %v1026_v29 = vld [vmem:[#allocation4 + $0x60] sm:$0xff]  ;;  %v1290_v62 = vld [vmem:[#allocation3 + $0x88] sm:$0xff] }
 0x1e9   :  { %1009 = vst.msk [vmem:[#allocation3 + $0xd8] sm:$0xff] %vm15_vm0, %v976_v21  ;;  %v977_v50 = vadd.f32 %v942_v47, %v625_v52  ;;  %v1021_v52 = vld [vmem:[#allocation4 + $0x38] sm:$0xff]  ;;  %v1027_v34 = vld [vmem:[#allocation4 + $0x68] sm:$0xff] }
 0x1ea   :  { %v944_v57 = vpop.xlane.xlu0 %943 }
 0x1eb   :  { %1010 = vst.msk [vmem:[#allocation3 + $0xe0] sm:$0xff] %vm15_vm0, %v977_v50  ;;  %v978_v42 = vadd.f32 %v944_v57, %v626_v61  ;;  %v1648_v61 = vpop.eup %1647 }
 0x1ec   :  { %v946_v23 = vpop.xlane.xlu1 %945 }
 0x1ed   :  { %1011 = vst.msk [vmem:[#allocation3 + $0xe8] sm:$0xff] %vm15_vm0, %v978_v42  ;;  %v979_v16 = vadd.f32 %v946_v23, %v627_v37  ;;  %v1286_v42 = vld [vmem:[#allocation3 + $0x68] sm:$0xff]  ;;  %v1372_v23 = vadd.f32 %v1312_v31, %v1244_v26  ;;  %v1292_v26 = vld [vmem:[#allocation3 + $0x98] sm:$0xff] }
 0x1ee   :  { %v948_v43 = vpop.xlane.xlu0 %947  ;;  %1661 = vlog2.f32 %v1286_v42 }
 0x1ef   :  { %1012 = vst.msk [vmem:[#allocation3 + $0xf0] sm:$0xff] %vm15_vm0, %v979_v16  ;;  %v980_v14 = vadd.f32 %v948_v43, %v628_v11  ;;  %v1650_v11 = vpop.eup %1649  ;;  %v1245_v43 = vld [vmem:[#allocation2 + $0x20] sm:$0xff] }
 0x1f0   :  { %v1079_v58 = vpop.xlane.xlu1 %1078  ;;  %v1373_v60 = vadd.f32 %v1314_v45, %v1245_v43  ;;  %v1320_v17 = vmul.f32 0.6931472, %v1650_v11  ;;  %v1029_v11 = vld [vmem:[#allocation4 + $0x78] sm:$0xff]  ;;  %v1293_v43 = vld [vmem:[#allocation3 + $0xa0] sm:$0xff] }
 0x1f1   :  { %1013 = vst.msk [vmem:[#allocation3 + $0xf8] sm:$0xff] %vm15_vm0, %v980_v14  ;;  %v1142_v53 = vadd.f32 %v1079_v58, %v1014_v59  ;;  %v1023_v14 = vld [vmem:[#allocation4 + $0x48] sm:$0xff]  ;;  %v1287_v58 = vld [vmem:[#allocation3 + $0x70] sm:$0xff] }
 0x1f2   :  { %v1081_v4 = vpop.xlane.xlu0 %1080  ;;  %1663 = vlog2.f32 %v1287_v58 }
 0x1f3   :  { %1174 = vst.msk [vmem:[#allocation4] sm:$0xff] %vm15_vm0, %v1142_v53  ;;  %v1143_v63 = vadd.f32 %v1081_v4, %v1015_v36  ;;  %v1318_v53 = vmul.f32 0.6931472, %v1648_v61  ;;  %v1652_v4 = vpop.eup %1651  ;;  %v1028_v61 = vld [vmem:[#allocation4 + $0x70] sm:$0xff] }
 0x1f4   :  { %v1083_v30 = vpop.xlane.xlu1 %1082  ;;  %v1654_v46 = vpop.eup %1653 }
 0x1f5   :  { %1175 = vst.msk [vmem:[#allocation4 + $0x8] sm:$0xff] %vm15_vm0, %v1143_v63  ;;  %v1144_v54 = vadd.f32 %v1083_v30, %v1016_v20  ;;  %v1246_v20 = vld [vmem:[#allocation2 + $0x28] sm:$0xff]  ;;  %v1288_v30 = vld [vmem:[#allocation3 + $0x78] sm:$0xff]  ;;  %v1656_v22 = vpop.eup %1655 }
 0x1f6   :  { %v1085_v27 = vpop.xlane.xlu0 %1084  ;;  %v1374_v56 = vadd.f32 %v1316_v1, %v1246_v20  ;;  %1665 = vlog2.f32 %v1288_v30  ;;  %v1294_v20 = vld [vmem:[#allocation3 + $0xa8] sm:$0xff] }
 0x1f7   :  { %1176 = vst.msk [vmem:[#allocation4 + $0x10] sm:$0xff] %vm15_vm0, %v1144_v54  ;;  %v1145_v49 = vadd.f32 %v1085_v27, %v1017_v40  ;;  %v1247_v27 = vld [vmem:[#allocation2 + $0x30] sm:$0xff] }
 0x1f8   :  { %v1087_v32 = vpop.xlane.xlu1 %1086  ;;  %v1375_v51 = vadd.f32 %v1318_v53, %v1247_v27  ;;  %v1295_v27 = vld [vmem:[#allocation3 + $0xb0] sm:$0xff] }
 0x1f9   :  { %1177 = vst.msk [vmem:[#allocation4 + $0x18] sm:$0xff] %vm15_vm0, %v1145_v49  ;;  %v1146_v2 = vadd.f32 %v1087_v32, %v1018_v0  ;;  %v1289_v49 = vld [vmem:[#allocation3 + $0x80] sm:$0xff]  ;;  %v1322_v32 = vmul.f32 0.6931472, %v1652_v4 }
 0x1fa   :  { %v1401_v10 = vld [vmem:[#allocation4] sm:$0xff]  ;;  %v1089_v19 = vpop.xlane.xlu0 %1088  ;;  %1667 = vlog2.f32 %v1289_v49 }
 0x1fb   :  { %v1433_v33 = vsub.f32 %v1369_v6, %v1401_v10  ;;  %1178 = vst.msk [vmem:[#allocation4 + $0x20] sm:$0xff] %vm15_vm0, %v1146_v2  ;;  %v1147_v24 = vadd.f32 %v1089_v19, %v1019_v3  ;;  %v1248_v6 = vld [vmem:[#allocation2 + $0x38] sm:$0xff]  ;;  %1669 = vlog2.f32 %v1290_v62  ;;  %v1030_v4 = vld [vmem:[#allocation4 + $0x80] sm:$0xff] }
 0x1fc   :  { %v1402_v9 = vld [vmem:[#allocation4 + $0x8] sm:$0xff]  ;;  %v1091_v21 = vpop.xlane.xlu1 %1090  ;;  %v1376_v19 = vadd.f32 %v1320_v17, %v1248_v6  ;;  %1671 = vlog2.f32 %v1291_v39  ;;  %v1296_v6 = vld [vmem:[#allocation3 + $0xb8] sm:$0xff] }
 0x1fd   :  { %1465 = vst.msk [vmem:[%s3098_s2] sm:$0xff] %vm15_vm0, %v1433_v33  ;;  %v1434_v47 = vsub.f32 %v1370_v48, %v1402_v9  ;;  %1179 = vst.msk [vmem:[#allocation4 + $0x28] sm:$0xff] %vm15_vm0, %v1147_v24  ;;  %v1148_v50 = vadd.f32 %v1091_v21, %v1020_v41  ;;  %v1324_v41 = vmul.f32 0.6931472, %v1654_v46  ;;  %v1658_v33 = vpop.eup %1657  ;;  %v1249_v48 = vld [vmem:[#allocation2 + $0x40] sm:$0xff]  ;;  %1673 = vlog2.f32 %v1292_v26  ;;  %v1031_v46 = vld [vmem:[#allocation4 + $0x88] sm:$0xff] }
 0x1fe   :  { %v1403_v57 = vld [vmem:[#allocation4 + $0x10] sm:$0xff]  ;;  %v1093_v5 = vpop.xlane.xlu0 %1092  ;;  %v1377_v21 = vadd.f32 %v1322_v32, %v1249_v48  ;;  %1675 = vlog2.f32 %v1293_v43  ;;  %v1297_v48 = vld [vmem:[#allocation3 + $0xc0] sm:$0xff] }
 0x1ff   :  { %1466 = vst.msk [vmem:[%s3098_s2 + $0x8] sm:$0xff] %vm15_vm0, %v1434_v47  ;;  %v1435_v37 = vsub.f32 %v1371_v12, %v1403_v57  ;;  %1180 = vst.msk [vmem:[#allocation4 + $0x30] sm:$0xff] %vm15_vm0, %v1148_v50  ;;  %v1149_v16 = vadd.f32 %v1093_v5, %v1021_v52  ;;  %v1326_v52 = vmul.f32 0.6931472, %v1656_v22  ;;  %v1660_v47 = vpop.eup %1659  ;;  %v1250_v12 = vld [vmem:[#allocation2 + $0x48] sm:$0xff]  ;;  %1677 = vlog2.f32 %v1294_v20  ;;  %v1032_v22 = vld [vmem:[#allocation4 + $0x90] sm:$0xff] }
 0x200   :  { %v1404_v59 = vld [vmem:[#allocation4 + $0x18] sm:$0xff]  ;;  %v1095_v28 = vpop.xlane.xlu1 %1094  ;;  %v1378_v5 = vadd.f32 %v1324_v41, %v1250_v12  ;;  %1679 = vlog2.f32 %v1295_v27  ;;  %v1298_v12 = vld [vmem:[#allocation3 + $0xc8] sm:$0xff] }
 0x201   :  { %1467 = vst.msk [vmem:[%s3098_s2 + $0x10] sm:$0xff] %vm15_vm0, %v1435_v37  ;;  %v1436_v36 = vsub.f32 %v1372_v23, %v1404_v59  ;;  %1181 = vst.msk [vmem:[#allocation4 + $0x38] sm:$0xff] %vm15_vm0, %v1149_v16  ;;  %v1150_v25 = vadd.f32 %v1095_v28, %v1022_v18  ;;  %v1328_v18 = vmul.f32 0.6931472, %v1658_v33  ;;  %v1662_v37 = vpop.eup %1661  ;;  %v1251_v23 = vld [vmem:[#allocation2 + $0x50] sm:$0xff]  ;;  %v1033_v33 = vld [vmem:[#allocation4 + $0x98] sm:$0xff]  ;;  %1681 = vlog2.f32 %v1296_v6 }
 0x202   :  { %v1405_v8 = vld [vmem:[#allocation4 + $0x20] sm:$0xff]  ;;  %v1097_v63 = vpop.xlane.xlu0 %1096  ;;  %v1379_v28 = vadd.f32 %v1326_v52, %v1251_v23  ;;  %1683 = vlog2.f32 %v1297_v48  ;;  %v1299_v23 = vld [vmem:[#allocation3 + $0xd0] sm:$0xff] }
 0x203   :  { %1468 = vst.msk [vmem:[%s3098_s2 + $0x18] sm:$0xff] %vm15_vm0, %v1436_v36  ;;  %v1437_v40 = vsub.f32 %v1373_v60, %v1405_v8  ;;  %1182 = vst.msk [vmem:[#allocation4 + $0x40] sm:$0xff] %vm15_vm0, %v1150_v25  ;;  %v1151_v54 = vadd.f32 %v1097_v63, %v1023_v14  ;;  %v1330_v14 = vmul.f32 0.6931472, %v1660_v47  ;;  %v1664_v36 = vpop.eup %1663  ;;  %v1252_v60 = vld [vmem:[#allocation2 + $0x58] sm:$0xff]  ;;  %v1034_v47 = vld [vmem:[#allocation4 + $0xa0] sm:$0xff]  ;;  %1685 = vlog2.f32 %v1298_v12 }
 0x204   :  { %v1406_v0 = vld [vmem:[#allocation4 + $0x28] sm:$0xff]  ;;  %v1099_v13 = vpop.xlane.xlu1 %1098  ;;  %v1380_v63 = vadd.f32 %v1328_v18, %v1252_v60  ;;  %v1300_v60 = vld [vmem:[#allocation3 + $0xd8] sm:$0xff]  ;;  %1687 = vlog2.f32 %v1299_v23 }
 0x205   :  { %1469 = vst.msk [vmem:[%s3098_s2 + $0x20] sm:$0xff] %vm15_vm0, %v1437_v40  ;;  %v1438_v55 = vsub.f32 %v1374_v56, %v1406_v0  ;;  %1183 = vst.msk [vmem:[#allocation4 + $0x48] sm:$0xff] %vm15_vm0, %v1151_v54  ;;  %v1152_v3 = vadd.f32 %v1099_v13, %v1024_v35  ;;  %v1332_v35 = vmul.f32 0.6931472, %v1662_v37  ;;  %v1666_v40 = vpop.eup %1665  ;;  %v1253_v56 = vld [vmem:[#allocation2 + $0x60] sm:$0xff]  ;;  %v1035_v37 = vld [vmem:[#allocation4 + $0xa8] sm:$0xff]  ;;  %1689 = vlog2.f32 %v1300_v60 }
 0x206   :  { %v1407_v38 = vld [vmem:[#allocation4 + $0x30] sm:$0xff]  ;;  %v1101_v2 = vpop.xlane.xlu0 %1100  ;;  %v1381_v13 = vadd.f32 %v1330_v14, %v1253_v56  ;;  %v1301_v56 = vld [vmem:[#allocation3 + $0xe0] sm:$0xff] }
 0x207   :  { %1470 = vst.msk [vmem:[%s3098_s2 + $0x28] sm:$0xff] %vm15_vm0, %v1438_v55  ;;  %v1439_v10 = vsub.f32 %v1375_v51, %v1407_v38  ;;  %1184 = vst.msk [vmem:[#allocation4 + $0x50] sm:$0xff] %vm15_vm0, %v1152_v3  ;;  %v1153_v15 = vadd.f32 %v1101_v2, %v1025_v7  ;;  %v1334_v7 = vmul.f32 0.6931472, %v1664_v36  ;;  %v1668_v55 = vpop.eup %1667  ;;  %v1254_v51 = vld [vmem:[#allocation2 + $0x68] sm:$0xff]  ;;  %v1036_v36 = vld [vmem:[#allocation4 + $0xb0] sm:$0xff]  ;;  %1691 = vlog2.f32 %v1301_v56 }
 0x208   :  { %v1408_v31 = vld [vmem:[#allocation4 + $0x38] sm:$0xff]  ;;  %v1103_v24 = vpop.xlane.xlu1 %1102  ;;  %v1382_v2 = vadd.f32 %v1332_v35, %v1254_v51  ;;  %v1302_v51 = vld [vmem:[#allocation3 + $0xe8] sm:$0xff]  ;;  %v1265_v60 = vld [vmem:[#allocation2 + $0xc0] sm:$0xff] }
 0x209   :  { %1471 = vst.msk [vmem:[%s3098_s2 + $0x30] sm:$0xff] %vm15_vm0, %v1439_v10  ;;  %v1440_v9 = vsub.f32 %v1376_v19, %v1408_v31  ;;  %1185 = vst.msk [vmem:[#allocation4 + $0x58] sm:$0xff] %vm15_vm0, %v1153_v15  ;;  %v1154_v44 = vadd.f32 %v1103_v24, %v1026_v29  ;;  %v1336_v29 = vmul.f32 0.6931472, %v1666_v40  ;;  %v1670_v10 = vpop.eup %1669  ;;  %v1255_v19 = vld [vmem:[#allocation2 + $0x70] sm:$0xff]  ;;  %v1037_v40 = vld [vmem:[#allocation4 + $0xb8] sm:$0xff]  ;;  %1693 = vlog2.f32 %v1302_v51 }
 0x20a   :  { %v1409_v45 = vld [vmem:[#allocation4 + $0x40] sm:$0xff]  ;;  %v1105_v50 = vpop.xlane.xlu0 %1104  ;;  %v1383_v24 = vadd.f32 %v1334_v7, %v1255_v19  ;;  %v1303_v19 = vld [vmem:[#allocation3 + $0xf0] sm:$0xff] }
 0x20b   :  { %1472 = vst.msk [vmem:[%s3098_s2 + $0x38] sm:$0xff] %vm15_vm0, %v1440_v9  ;;  %v1441_v57 = vsub.f32 %v1377_v21, %v1409_v45  ;;  %1186 = vst.msk [vmem:[#allocation4 + $0x60] sm:$0xff] %vm15_vm0, %v1154_v44  ;;  %v1155_v42 = vadd.f32 %v1105_v50, %v1027_v34  ;;  %v1338_v34 = vmul.f32 0.6931472, %v1668_v55  ;;  %v1672_v9 = vpop.eup %1671  ;;  %v1256_v21 = vld [vmem:[#allocation2 + $0x78] sm:$0xff]  ;;  %v1038_v55 = vld [vmem:[#allocation4 + $0xc0] sm:$0xff]  ;;  %1695 = vlog2.f32 %v1303_v19 }
 0x20c   :  { %v1410_v1 = vld [vmem:[#allocation4 + $0x48] sm:$0xff]  ;;  %v1107_v16 = vpop.xlane.xlu1 %1106  ;;  %v1384_v50 = vadd.f32 %v1336_v29, %v1256_v21  ;;  %v1304_v21 = vld [vmem:[#allocation3 + $0xf8] sm:$0xff] }
 0x20d   :  { %1473 = vst.msk [vmem:[%s3098_s2 + $0x40] sm:$0xff] %vm15_vm0, %v1441_v57  ;;  %v1442_v59 = vsub.f32 %v1378_v5, %v1410_v1  ;;  %1187 = vst.msk [vmem:[#allocation4 + $0x68] sm:$0xff] %vm15_vm0, %v1155_v42  ;;  %v1156_v58 = vadd.f32 %v1107_v16, %v1028_v61  ;;  %v1340_v61 = vmul.f32 0.6931472, %v1670_v10  ;;  %v1674_v57 = vpop.eup %1673  ;;  %v1257_v5 = vld [vmem:[#allocation2 + $0x80] sm:$0xff]  ;;  %v1039_v10 = vld [vmem:[#allocation4 + $0xc8] sm:$0xff]  ;;  %1697 = vlog2.f32 %v1304_v21 }
 0x20e   :  { %v1411_v53 = vld [vmem:[#allocation4 + $0x50] sm:$0xff]  ;;  %v1109_v25 = vpop.xlane.xlu0 %1108  ;;  %v1385_v16 = vadd.f32 %v1338_v34, %v1257_v5  ;;  %v1270_v21 = vld [vmem:[#allocation2 + $0xe8] sm:$0xff] }
 0x20f   :  { %1474 = vst.msk [vmem:[%s3098_s2 + $0x48] sm:$0xff] %vm15_vm0, %v1442_v59  ;;  %v1443_v8 = vsub.f32 %v1379_v28, %v1411_v53  ;;  %1188 = vst.msk [vmem:[#allocation4 + $0x70] sm:$0xff] %vm15_vm0, %v1156_v58  ;;  %v1157_v30 = vadd.f32 %v1109_v25, %v1029_v11  ;;  %v1342_v11 = vmul.f32 0.6931472, %v1672_v9  ;;  %v1676_v59 = vpop.eup %1675  ;;  %v1258_v28 = vld [vmem:[#allocation2 + $0x88] sm:$0xff]  ;;  %v1040_v9 = vld [vmem:[#allocation4 + $0xd0] sm:$0xff] }
 0x210   :  { %v1412_v17 = vld [vmem:[#allocation4 + $0x58] sm:$0xff]  ;;  %v1111_v54 = vpop.xlane.xlu1 %1110  ;;  %v1386_v25 = vadd.f32 %v1340_v61, %v1258_v28 }
 0x211   :  { %1475 = vst.msk [vmem:[%s3098_s2 + $0x50] sm:$0xff] %vm15_vm0, %v1443_v8  ;;  %v1444_v0 = vsub.f32 %v1380_v63, %v1412_v17  ;;  %1189 = vst.msk [vmem:[#allocation4 + $0x78] sm:$0xff] %vm15_vm0, %v1157_v30  ;;  %v1158_v49 = vadd.f32 %v1111_v54, %v1030_v4  ;;  %v1344_v4 = vmul.f32 0.6931472, %v1674_v57  ;;  %v1678_v8 = vpop.eup %1677  ;;  %v1259_v63 = vld [vmem:[#allocation2 + $0x90] sm:$0xff]  ;;  %v1041_v57 = vld [vmem:[#allocation4 + $0xd8] sm:$0xff] }
 0x212   :  { %v1413_v32 = vld [vmem:[#allocation4 + $0x60] sm:$0xff]  ;;  %v1113_v3 = vpop.xlane.xlu0 %1112  ;;  %v1387_v54 = vadd.f32 %v1342_v11, %v1259_v63 }
 0x213   :  { %1476 = vst.msk [vmem:[%s3098_s2 + $0x58] sm:$0xff] %vm15_vm0, %v1444_v0  ;;  %v1445_v38 = vsub.f32 %v1381_v13, %v1413_v32  ;;  %1190 = vst.msk [vmem:[#allocation4 + $0x80] sm:$0xff] %vm15_vm0, %v1158_v49  ;;  %v1159_v62 = vadd.f32 %v1113_v3, %v1031_v46  ;;  %v1346_v46 = vmul.f32 0.6931472, %v1676_v59  ;;  %v1680_v0 = vpop.eup %1679  ;;  %v1260_v13 = vld [vmem:[#allocation2 + $0x98] sm:$0xff] }
 0x214   :  { %v1414_v41 = vld [vmem:[#allocation4 + $0x68] sm:$0xff]  ;;  %v1115_v15 = vpop.xlane.xlu1 %1114  ;;  %v1388_v3 = vadd.f32 %v1344_v4, %v1260_v13 }
 0x215   :  { %1477 = vst.msk [vmem:[%s3098_s2 + $0x60] sm:$0xff] %vm15_vm0, %v1445_v38  ;;  %v1446_v31 = vsub.f32 %v1382_v2, %v1414_v41  ;;  %1191 = vst.msk [vmem:[#allocation4 + $0x88] sm:$0xff] %vm15_vm0, %v1159_v62  ;;  %v1160_v39 = vadd.f32 %v1115_v15, %v1032_v22  ;;  %v1348_v22 = vmul.f32 0.6931472, %v1678_v8  ;;  %v1682_v38 = vpop.eup %1681  ;;  %v1261_v2 = vld [vmem:[#allocation2 + $0xa0] sm:$0xff]  ;;  %v1043_v4 = vld [vmem:[#allocation4 + $0xe8] sm:$0xff] }
 0x216   :  { %v1415_v52 = vld [vmem:[#allocation4 + $0x70] sm:$0xff]  ;;  %v1117_v44 = vpop.xlane.xlu0 %1116  ;;  %v1389_v15 = vadd.f32 %v1346_v46, %v1261_v2 }
 0x217   :  { %1478 = vst.msk [vmem:[%s3098_s2 + $0x68] sm:$0xff] %vm15_vm0, %v1446_v31  ;;  %v1447_v45 = vsub.f32 %v1383_v24, %v1415_v52  ;;  %1192 = vst.msk [vmem:[#allocation4 + $0x90] sm:$0xff] %vm15_vm0, %v1160_v39  ;;  %v1161_v26 = vadd.f32 %v1117_v44, %v1033_v33  ;;  %v1350_v33 = vmul.f32 0.6931472, %v1680_v0  ;;  %v1684_v31 = vpop.eup %1683  ;;  %v1262_v24 = vld [vmem:[#allocation2 + $0xa8] sm:$0xff] }
 0x218   :  { %v1416_v18 = vld [vmem:[#allocation4 + $0x78] sm:$0xff]  ;;  %v1119_v42 = vpop.xlane.xlu1 %1118  ;;  %v1390_v44 = vadd.f32 %v1348_v22, %v1262_v24 }
 0x219   :  { %1479 = vst.msk [vmem:[%s3098_s2 + $0x70] sm:$0xff] %vm15_vm0, %v1447_v45  ;;  %v1448_v1 = vsub.f32 %v1384_v50, %v1416_v18  ;;  %1193 = vst.msk [vmem:[#allocation4 + $0x98] sm:$0xff] %vm15_vm0, %v1161_v26  ;;  %v1162_v43 = vadd.f32 %v1119_v42, %v1034_v47  ;;  %v1352_v47 = vmul.f32 0.6931472, %v1682_v38  ;;  %v1686_v45 = vpop.eup %1685  ;;  %v1263_v50 = vld [vmem:[#allocation2 + $0xb0] sm:$0xff] }
 0x21a   :  { %v1417_v14 = vld [vmem:[#allocation4 + $0x80] sm:$0xff]  ;;  %v1121_v58 = vpop.xlane.xlu0 %1120  ;;  %v1391_v18 = vadd.f32 %v1350_v33, %v1263_v50  ;;  %v1354_v42 = vmul.f32 0.6931472, %v1684_v31  ;;  %v1688_v23 = vpop.eup %1687 }
 0x21b   :  { %1480 = vst.msk [vmem:[%s3098_s2 + $0x78] sm:$0xff] %vm15_vm0, %v1448_v1  ;;  %v1449_v53 = vsub.f32 %v1385_v16, %v1417_v14  ;;  %1194 = vst.msk [vmem:[#allocation4 + $0xa0] sm:$0xff] %vm15_vm0, %v1162_v43  ;;  %v1163_v20 = vadd.f32 %v1121_v58, %v1035_v37  ;;  %v1264_v1 = vld [vmem:[#allocation2 + $0xb8] sm:$0xff]  ;;  %v1042_v43 = vld [vmem:[#allocation4 + $0xe0] sm:$0xff]  ;;  %v1356_v14 = vmul.f32 0.6931472, %v1686_v45 }
 0x21c   :  { %v1418_v35 = vld [vmem:[#allocation4 + $0x88] sm:$0xff]  ;;  %v1123_v30 = vpop.xlane.xlu1 %1122  ;;  %v1392_v28 = vadd.f32 %v1352_v47, %v1264_v1  ;;  %v1393_v8 = vadd.f32 %v1354_v42, %v1265_v60  ;;  %v1358_v63 = vmul.f32 0.6931472, %v1688_v23  ;;  %v1269_v31 = vld [vmem:[#allocation2 + $0xe0] sm:$0xff]  ;;  %v1271_v45 = vld [vmem:[#allocation2 + $0xf0] sm:$0xff] }
 0x21d   :  { %1481 = vst.msk [vmem:[%s3098_s2 + $0x80] sm:$0xff] %vm15_vm0, %v1449_v53  ;;  %v1450_v17 = vsub.f32 %v1386_v25, %v1418_v35  ;;  %1195 = vst.msk [vmem:[#allocation4 + $0xa8] sm:$0xff] %vm15_vm0, %v1163_v20  ;;  %v1164_v27 = vadd.f32 %v1123_v30, %v1036_v36  ;;  %v1690_v36 = vpop.eup %1689 }
 0x21e   :  { %v1419_v7 = vld [vmem:[#allocation4 + $0x90] sm:$0xff]  ;;  %v1125_v49 = vpop.xlane.xlu0 %1124  ;;  %v1692_v30 = vpop.eup %1691  ;;  %v1360_v0 = vmul.f32 0.6931472, %v1690_v36 }
 0x21f   :  { %1482 = vst.msk [vmem:[%s3098_s2 + $0x88] sm:$0xff] %vm15_vm0, %v1450_v17  ;;  %v1451_v32 = vsub.f32 %v1387_v54, %v1419_v7  ;;  %1196 = vst.msk [vmem:[#allocation4 + $0xb0] sm:$0xff] %vm15_vm0, %v1164_v27  ;;  %v1165_v6 = vadd.f32 %v1125_v49, %v1037_v40  ;;  %v1266_v40 = vld [vmem:[#allocation2 + $0xc8] sm:$0xff]  ;;  %v1044_v54 = vld [vmem:[#allocation4 + $0xf0] sm:$0xff]  ;;  %v1694_v7 = vpop.eup %1693 }
 0x220   :  { %v1420_v29 = vld [vmem:[#allocation4 + $0x98] sm:$0xff]  ;;  %v1127_v62 = vpop.xlane.xlu1 %1126  ;;  %v1394_v27 = vadd.f32 %v1356_v14, %v1266_v40  ;;  %v1267_v49 = vld [vmem:[#allocation2 + $0xd0] sm:$0xff]  ;;  %v1696_v2 = vpop.eup %1695 }
 0x221   :  { %1483 = vst.msk [vmem:[%s3098_s2 + $0x90] sm:$0xff] %vm15_vm0, %v1451_v32  ;;  %v1452_v41 = vsub.f32 %v1388_v3, %v1420_v29  ;;  %1197 = vst.msk [vmem:[#allocation4 + $0xb8] sm:$0xff] %vm15_vm0, %v1165_v6  ;;  %v1166_v48 = vadd.f32 %v1127_v62, %v1038_v55  ;;  %v1045_v32 = vld [vmem:[#allocation4 + $0xf8] sm:$0xff]  ;;  %v1395_v22 = vadd.f32 %v1358_v63, %v1267_v49  ;;  %v1362_v6 = vmul.f32 0.6931472, %v1692_v30 }
 0x222   :  { %v1421_v34 = vld [vmem:[#allocation4 + $0xa0] sm:$0xff]  ;;  %v1129_v39 = vpop.xlane.xlu0 %1128  ;;  %v1268_v29 = vld [vmem:[#allocation2 + $0xd8] sm:$0xff] }
 0x223   :  { %1484 = vst.msk [vmem:[%s3098_s2 + $0x98] sm:$0xff] %vm15_vm0, %v1452_v41  ;;  %v1453_v52 = vsub.f32 %v1389_v15, %v1421_v34  ;;  %1198 = vst.msk [vmem:[#allocation4 + $0xc0] sm:$0xff] %vm15_vm0, %v1166_v48  ;;  %v1167_v12 = vadd.f32 %v1129_v39, %v1039_v10  ;;  %v1396_v41 = vadd.f32 %v1360_v0, %v1268_v29  ;;  %v1364_v15 = vmul.f32 0.6931472, %v1694_v7  ;;  %v1698_v48 = vpop.eup %1697 }
 0x224   :  { %v1422_v61 = vld [vmem:[#allocation4 + $0xa8] sm:$0xff]  ;;  %v1131_v26 = vpop.xlane.xlu1 %1130  ;;  %v1397_v39 = vadd.f32 %v1362_v6, %v1269_v31 }
 0x225   :  { %1485 = vst.msk [vmem:[%s3098_s2 + $0xa0] sm:$0xff] %vm15_vm0, %v1453_v52  ;;  %v1454_v5 = vsub.f32 %v1390_v44, %v1422_v61  ;;  %1199 = vst.msk [vmem:[#allocation4 + $0xc8] sm:$0xff] %vm15_vm0, %v1167_v12  ;;  %v1168_v37 = vadd.f32 %v1131_v26, %v1040_v9  ;;  %v1366_v9 = vmul.f32 0.6931472, %v1696_v2  ;;  %v1398_v47 = vadd.f32 %v1364_v15, %v1270_v21 }
 0x226   :  { %v1423_v16 = vld [vmem:[#allocation4 + $0xb0] sm:$0xff]  ;;  %v1133_v11 = vpop.xlane.xlu0 %1132  ;;  %v1368_v12 = vmul.f32 0.6931472, %v1698_v48 }
 0x227   :  { %1486 = vst.msk [vmem:[%s3098_s2 + $0xa8] sm:$0xff] %vm15_vm0, %v1454_v5  ;;  %v1455_v59 = vsub.f32 %v1391_v18, %v1423_v16  ;;  %1200 = vst.msk [vmem:[#allocation4 + $0xd0] sm:$0xff] %vm15_vm0, %v1168_v37  ;;  %v1169_v58 = vadd.f32 %v1133_v11, %v1041_v57  ;;  %v1399_v26 = vadd.f32 %v1366_v9, %v1271_v45  ;;  %v1272_v57 = vld [vmem:[#allocation2 + $0xf8] sm:$0xff] }
 0x228   :  { %v1424_v53 = vld [vmem:[#allocation4 + $0xb8] sm:$0xff]  ;;  %v1135_v25 = vpop.xlane.xlu1 %1134  ;;  %v1400_v42 = vadd.f32 %v1368_v12, %v1272_v57 }
 0x229   :  { %1487 = vst.msk [vmem:[%s3098_s2 + $0xb0] sm:$0xff] %vm15_vm0, %v1455_v59  ;;  %v1456_v20 = vsub.f32 %v1392_v28, %v1424_v53  ;;  %1201 = vst.msk [vmem:[#allocation4 + $0xd8] sm:$0xff] %vm15_vm0, %v1169_v58  ;;  %v1170_v35 = vadd.f32 %v1135_v25, %v1042_v43 }
 0x22a   :  { %v1425_v56 = vld [vmem:[#allocation4 + $0xc0] sm:$0xff]  ;;  %v1137_v17 = vpop.xlane.xlu0 %1136 }
 0x22b   :  { %1488 = vst.msk [vmem:[%s3098_s2 + $0xb8] sm:$0xff] %vm15_vm0, %v1456_v20  ;;  %v1457_v46 = vsub.f32 %v1393_v8, %v1425_v56  ;;  %1202 = vst.msk [vmem:[#allocation4 + $0xe0] sm:$0xff] %vm15_vm0, %v1170_v35  ;;  %v1171_v13 = vadd.f32 %v1137_v17, %v1043_v4 }
 0x22c   :  { %v1426_v55 = vld [vmem:[#allocation4 + $0xc8] sm:$0xff]  ;;  %v1139_v51 = vpop.xlane.xlu1 %1138 }
 0x22d   :  { %1489 = vst.msk [vmem:[%s3098_s2 + $0xc0] sm:$0xff] %vm15_vm0, %v1457_v46  ;;  %v1458_v3 = vsub.f32 %v1394_v27, %v1426_v55  ;;  %1203 = vst.msk [vmem:[#allocation4 + $0xe8] sm:$0xff] %vm15_vm0, %v1171_v13  ;;  %v1172_v38 = vadd.f32 %v1139_v51, %v1044_v54 }
 0x22e   :  { %v1427_v62 = vld [vmem:[#allocation4 + $0xd0] sm:$0xff]  ;;  %v1141_v10 = vpop.xlane.xlu0 %1140 }
 0x22f   :  { %1490 = vst.msk [vmem:[%s3098_s2 + $0xc8] sm:$0xff] %vm15_vm0, %v1458_v3  ;;  %v1459_v19 = vsub.f32 %v1395_v22, %v1427_v62  ;;  %1204 = vst.msk [vmem:[#allocation4 + $0xf0] sm:$0xff] %vm15_vm0, %v1172_v38  ;;  %v1173_v33 = vadd.f32 %v1141_v10, %v1045_v32 }
 0x230   :  { %v1428_v24 = vld [vmem:[#allocation4 + $0xd8] sm:$0xff] }
 0x231   :  { %1491 = vst.msk [vmem:[%s3098_s2 + $0xd0] sm:$0xff] %vm15_vm0, %v1459_v19  ;;  %v1460_v34 = vsub.f32 %v1396_v41, %v1428_v24  ;;  %1205 = vst.msk [vmem:[#allocation4 + $0xf8] sm:$0xff] %vm15_vm0, %v1173_v33 }
 0x232   :  { %v1429_v52 = vld [vmem:[#allocation4 + $0xe0] sm:$0xff] }
 0x233   :  { %1492 = vst.msk [vmem:[%s3098_s2 + $0xd8] sm:$0xff] %vm15_vm0, %v1460_v34  ;;  %v1461_v44 = vsub.f32 %v1397_v39, %v1429_v52 }
 0x234   :  { %v1430_v50 = vld [vmem:[#allocation4 + $0xe8] sm:$0xff] }
 0x235   :  { %1493 = vst.msk [vmem:[%s3098_s2 + $0xe0] sm:$0xff] %vm15_vm0, %v1461_v44  ;;  %v1462_v61 = vsub.f32 %v1398_v47, %v1430_v50 }
 0x236   :  { %v1431_v5 = vld [vmem:[#allocation4 + $0xf0] sm:$0xff] }
 0x237   :  { %1494 = vst.msk [vmem:[%s3098_s2 + $0xe8] sm:$0xff] %vm15_vm0, %v1462_v61  ;;  %v1463_v18 = vsub.f32 %v1399_v26, %v1431_v5 }
 0x238   :  { %v1432_v37 = vld [vmem:[#allocation4 + $0xf8] sm:$0xff] }
 0x239   :  { %1495 = vst.msk [vmem:[%s3098_s2 + $0xf0] sm:$0xff] %vm15_vm0, %v1463_v18  ;;  %v1464_v23 = vsub.f32 %v1400_v42, %v1432_v37 }
 0x23b   :  { %1496 = vst.msk [vmem:[%s3098_s2 + $0xf8] sm:$0xff] %vm15_vm0, %v1464_v23 }

</bundles_post_ra>
